<compile_context>
chip_gen: v7x
topology: tpu7x:2x2x1
jax: 0.10.0
libtpu: 0.0.40
codegen_flags: <defaults>
</compile_context>

<pallas_src>
import functools

import jax
import jax.numpy as jnp
from jax.experimental import pallas as pl
from jax.experimental.pallas import tpu as pltpu


def _conv_bn_relu_kernel(x_ref, w_ref, b_ref, o_ref, *,
                         KH, KW, stride, dilation, tile_ho, Wo, Cin,
                         apply_relu):
    """One (batch, output-row-band) tile per grid step.

    x_ref: [band_h, Wq, stride*Cin]  halo'd input row band (W space-to-depth'd)
    w_ref: [Cout, KH*KW*Cin]         BN-scale-folded weights (bf16)
    b_ref: [Cout, 1]                 folded BN bias (f32)
    o_ref: [Cout, tile_ho*Wo]        lane-dense output band
    """
    x = x_ref[...]
    s = stride

    # im2col: one contiguous slice per tap, concatenated on the lane axis so
    # the whole band reduces to a single MXU matmul with K = KH*KW*Cin.
    taps = []
    for kh in range(KH):
        for kw in range(KW):
            h0 = kh * dilation
            q0, r = divmod(kw * dilation, s)
            p = jax.lax.slice(
                x, (h0, q0, r * Cin),
                (h0 + s * tile_ho, q0 + Wo, (r + 1) * Cin))   # [s*T, Wo, Cin]
            if s > 1:
                # H-stride via a leading-dim split (no strided slices needed).
                p = p.reshape(tile_ho, s, Wo, Cin)[:, 0]
            taps.append(p)
    patches = jnp.concatenate(taps, axis=-1)                  # [T, Wo, KH*KW*Cin]
    patches = patches.reshape(tile_ho * Wo, KH * KW * Cin)
    patches = patches.astype(w_ref.dtype)                     # bf16 MXU operand

    # Single "NT" matmul on the MXU: (Cout, K) x (M, K)^T -> (Cout, M),
    # which makes the output block lane-dense (last dim = tile_ho*Wo).
    acc = jax.lax.dot_general(
        w_ref[...], patches,
        dimension_numbers=(((1,), (1,)), ((), ())),
        preferred_element_type=jnp.float32)

    y = acc + b_ref[...]                 # folded BN bias (f32 epilogue)
    if apply_relu:
        y = jnp.maximum(y, 0.0)
    o_ref[...] = y.astype(o_ref.dtype)


def _pick_tile_ho(Ho, Wo, Wq, in_ch, Cout, stride, dilation, KH,
                  in_itemsize, out_itemsize, budget_bytes=4 * 1024 * 1024):
    """Largest row-band (divisor of Ho with a lane-aligned output band) whose
    double-buffered VMEM footprint fits a conservative budget (v7x: 64 MiB)."""
    cands = sorted(d for d in range(1, Ho + 1)
                   if Ho % d == 0 and (d == Ho or (d * Wo) % 128 == 0))
    best = cands[0]
    for d in cands:
        band_h = stride * d + dilation * (KH - 1)
        need = 2 * (band_h * Wq * in_ch * in_itemsize
                    + Cout * d * Wo * out_itemsize)
        if need <= budget_bytes:
            best = d
    return best


def basic_conv(x_nchw, weight_oihw, bn_gamma=None, bn_beta=None,
               bn_mean=None, bn_var=None, conv_bias=None, *,
               stride=1, padding=0, dilation=1, relu=True, bn=True,
               eps=1e-5, tile_ho=None, compute_dtype=jnp.bfloat16):
    """BasicConv forward. Input NCHW, weight OIHW (PyTorch convention)."""
    N, Cin, H, W = x_nchw.shape
    Cout, Cin_w, KH, KW = weight_oihw.shape
    assert Cin == Cin_w, "groups != 1 not supported"  # TODO(synk): groups > 1
    s = stride

    Ho = (H + 2 * padding - dilation * (KH - 1) - 1) // s + 1
    Wo = (W + 2 * padding - dilation * (KW - 1) - 1) // s + 1

    # ---- Fold BatchNorm (inference: running stats) + conv bias into (w, b). ----
    w_f32 = weight_oihw.astype(jnp.float32)
    if bn:
        scale = bn_gamma.astype(jnp.float32) * jax.lax.rsqrt(
            bn_var.astype(jnp.float32) + eps)
        shift = bn_beta.astype(jnp.float32) - bn_mean.astype(jnp.float32) * scale
    else:
        scale = jnp.ones((Cout,), jnp.float32)
        shift = jnp.zeros((Cout,), jnp.float32)
    if conv_bias is not None:
        shift = shift + conv_bias.astype(jnp.float32) * scale
    w_folded = w_f32 * scale[:, None, None, None]
    # OIHW -> [Cout, KH*KW*Cin] with taps ordered (kh, kw, cin); bf16 for MXU.
    w2t = jnp.transpose(w_folded, (0, 2, 3, 1)).reshape(Cout, KH * KW * Cin)
    w2t = w2t.astype(compute_dtype)
    bias_col = shift.reshape(Cout, 1)

    # ---- Layout: NCHW -> NHWC, pad, W space-to-depth (stride folded into the
    # channel axis) and halo'd output-row bands so every in-kernel slice is
    # contiguous and every BlockSpec is a plain block index. ----
    x = jnp.transpose(x_nchw, (0, 2, 3, 1))                  # NHWC, keep f32
    Hp, Wp = H + 2 * padding, W + 2 * padding
    Wq = -(-Wp // s)
    xp = jnp.pad(x, ((0, 0), (padding, padding + s - 1),
                     (padding, padding + Wq * s - Wp), (0, 0)))
    xq = xp.reshape(N, Hp + s - 1, Wq, s * Cin)

    if tile_ho is None:
        tile_ho = _pick_tile_ho(
            Ho, Wo, Wq, s * Cin, Cout, s, dilation, KH,
            jnp.dtype(x_nchw.dtype).itemsize, jnp.dtype(x_nchw.dtype).itemsize)
    assert Ho % tile_ho == 0 and (tile_ho == Ho or (tile_ho * Wo) % 128 == 0), \
        "tile_ho must divide Ho and give a lane-aligned output band"
    num_hb = Ho // tile_ho
    band_h = s * tile_ho + dilation * (KH - 1)

    row_idx = (jnp.arange(num_hb) * (tile_ho * s))[:, None] + \
        jnp.arange(band_h)[None, :]
    x_bands = xq[:, row_idx]              # [N, num_hb, band_h, Wq, s*Cin]

    kernel = functools.partial(
        _conv_bn_relu_kernel, KH=KH, KW=KW, stride=s, dilation=dilation,
        tile_ho=tile_ho, Wo=Wo, Cin=Cin, apply_relu=relu)

    out = pl.pallas_call(
        kernel,
        out_shape=jax.ShapeDtypeStruct((N, Cout, Ho * Wo), x_nchw.dtype),
        grid_spec=pltpu.PrefetchScalarGridSpec(
            num_scalar_prefetch=0,
            grid=(N, num_hb),
            in_specs=[
                pl.BlockSpec((None, None, band_h, Wq, s * Cin),
                             lambda n, hb: (n, hb, 0, 0, 0)),
                pl.BlockSpec((Cout, KH * KW * Cin), lambda n, hb: (0, 0)),
                pl.BlockSpec((Cout, 1), lambda n, hb: (0, 0)),
            ],
            out_specs=pl.BlockSpec((None, Cout, tile_ho * Wo),
                                   lambda n, hb: (n, 0, hb)),
        ),
        compiler_params=pltpu.CompilerParams(
            dimension_semantics=("parallel", "parallel"),
            vmem_limit_bytes=32 * 1024 * 1024),
    )(x_bands, w2t, bias_col)

    # Output is already channel-major: just unflatten the spatial dims (NCHW).
    return out.reshape(N, Cout, Ho, Wo)


def _reference(x_nchw, weight_oihw, bn_gamma, bn_beta, bn_mean, bn_var, *,
               stride, padding, dilation, relu, bn, eps=1e-5,
               compute_dtype=jnp.bfloat16):
    """Plain-JAX reference with the same folded-BN / bf16-operand math."""
    Cout = weight_oihw.shape[0]
    w = weight_oihw.astype(jnp.float32)
    if bn:
        scale = bn_gamma.astype(jnp.float32) * jax.lax.rsqrt(
            bn_var.astype(jnp.float32) + eps)
        shift = bn_beta.astype(jnp.float32) - bn_mean.astype(jnp.float32) * scale
    else:
        scale = jnp.ones((Cout,), jnp.float32)
        shift = jnp.zeros((Cout,), jnp.float32)
    w_folded = (w * scale[:, None, None, None]).astype(compute_dtype)
    y = jax.lax.conv_general_dilated(
        x_nchw.astype(compute_dtype), w_folded,
        window_strides=(stride, stride),
        padding=[(padding, padding), (padding, padding)],
        rhs_dilation=(dilation, dilation),
        dimension_numbers=("NCHW", "OIHW", "NCHW"),
        preferred_element_type=jnp.float32)
    y = y + shift.reshape(1, -1, 1, 1)
    if relu:
        y = jnp.maximum(y, 0.0)
    return y.astype(x_nchw.dtype)


if __name__ == "__main__":
    def run_case(key, N, Cin, H, W, Cout, K, *, stride=1, padding=0,
                 dilation=1, relu=True, bn=True, tile_ho=None):
        kx, kw, kg, kb, km, kv = jax.random.split(key, 6)
        x = jax.random.normal(kx, (N, Cin, H, W), jnp.float32)
        fan_in = Cin * K * K
        bound = 1.0 / (fan_in ** 0.5)
        weight = jax.random.uniform(kw, (Cout, Cin, K, K), jnp.float32,
                                    minval=-bound, maxval=bound)
        gamma = jax.random.uniform(kg, (Cout,), jnp.float32,
                                   minval=0.5, maxval=1.5)
        beta = jax.random.normal(kb, (Cout,), jnp.float32) * 0.1
        mean = jax.random.normal(km, (Cout,), jnp.float32) * 0.1
        var = jax.random.uniform(kv, (Cout,), jnp.float32,
                                 minval=0.5, maxval=1.5)

        out = basic_conv(x, weight, gamma, beta, mean, var,
                         stride=stride, padding=padding, dilation=dilation,
                         relu=relu, bn=bn, tile_ho=tile_ho)
        out = jax.block_until_ready(out)

        ref = _reference(x, weight, gamma, beta, mean, var,
                         stride=stride, padding=padding, dilation=dilation,
                         relu=relu, bn=bn)
        assert out.shape == ref.shape, (out.shape, ref.shape)
        err = float(jnp.max(jnp.abs(out - ref)))
        assert err < 2e-3, err

    key = jax.random.PRNGKey(0)
    k1, k2, k3 = jax.random.split(key, 3)
    # BasicConv(4, 8, kernel_size=3, stride=1, padding=1) — the spec config.
    run_case(k1, 2, 4, 16, 16, 8, 3, stride=1, padding=1)
    # stride=2 with forced row-band tiling (two halo'd bands of 8 output rows).
    run_case(k2, 2, 4, 32, 32, 8, 3, stride=2, padding=1, tile_ho=8)
    # bn=False / relu=False branches.
    run_case(k3, 2, 4, 16, 16, 8, 3, stride=1, padding=1, relu=False, bn=False)

    print("KERNEL_OK")
</pallas_src>

<mosaic_0001>
module attributes {stable_mosaic.version = 11 : i64} {
  func.func @_conv_bn_relu_kernel(%arg0: i32, %arg1: i32, %arg2: memref<1x1x18x18x4xf32, #tpu.memory_space<vmem>>, %arg3: memref<8x36xbf16, #tpu.memory_space<vmem>>, %arg4: memref<8x1xf32, #tpu.memory_space<vmem>>, %arg5: memref<1x8x256xf32, #tpu.memory_space<vmem>>) attributes {dimension_semantics = [#tpu.dimension_semantics<parallel>, #tpu.dimension_semantics<parallel>], iteration_bounds = array<i64: 2, 1>, scalar_prefetch = 0 : i64, scratch_operands = 0 : i64, tpu.core_type = #tpu.core_type<tc>, window_params = [{transform_indices = @transform_0, window_bounds = array<i64: 1, 1, 18, 18, 4>}, {pipeline_mode = #tpu.pipeline_mode<synchronous>, transform_indices = @transform_1, window_bounds = array<i64: 8, 36>}, {pipeline_mode = #tpu.pipeline_mode<synchronous>, transform_indices = @transform_2, window_bounds = array<i64: 8, 1>}, {transform_indices = @transform_3, window_bounds = array<i64: 1, 8, 256>}]} {
    %c0 = arith.constant 0 : index
    %c0_0 = arith.constant 0 : index
    %c0_1 = arith.constant 0 : index
    %c0_2 = arith.constant 0 : index
    %c0_3 = arith.constant 0 : index
    %0 = vector.load %arg2[%c0, %c0_0, %c0_1, %c0_2, %c0_3] : memref<1x1x18x18x4xf32, #tpu.memory_space<vmem>>, vector<1x1x18x18x4xf32>
    %1 = vector.shape_cast %0 : vector<1x1x18x18x4xf32> to vector<18x18x4xf32>
    %2 = vector.extract_strided_slice %1 {offsets = [0, 0, 0], sizes = [16, 16, 4], strides = [1, 1, 1]} : vector<18x18x4xf32> to vector<16x16x4xf32>
    %3 = vector.extract_strided_slice %1 {offsets = [0, 1, 0], sizes = [16, 16, 4], strides = [1, 1, 1]} : vector<18x18x4xf32> to vector<16x16x4xf32>
    %4 = vector.extract_strided_slice %1 {offsets = [0, 2, 0], sizes = [16, 16, 4], strides = [1, 1, 1]} : vector<18x18x4xf32> to vector<16x16x4xf32>
    %5 = vector.extract_strided_slice %1 {offsets = [1, 0, 0], sizes = [16, 16, 4], strides = [1, 1, 1]} : vector<18x18x4xf32> to vector<16x16x4xf32>
    %6 = vector.extract_strided_slice %1 {offsets = [1, 1, 0], sizes = [16, 16, 4], strides = [1, 1, 1]} : vector<18x18x4xf32> to vector<16x16x4xf32>
    %7 = vector.extract_strided_slice %1 {offsets = [1, 2, 0], sizes = [16, 16, 4], strides = [1, 1, 1]} : vector<18x18x4xf32> to vector<16x16x4xf32>
    %8 = vector.extract_strided_slice %1 {offsets = [2, 0, 0], sizes = [16, 16, 4], strides = [1, 1, 1]} : vector<18x18x4xf32> to vector<16x16x4xf32>
    %9 = vector.extract_strided_slice %1 {offsets = [2, 1, 0], sizes = [16, 16, 4], strides = [1, 1, 1]} : vector<18x18x4xf32> to vector<16x16x4xf32>
    %10 = vector.extract_strided_slice %1 {offsets = [2, 2, 0], sizes = [16, 16, 4], strides = [1, 1, 1]} : vector<18x18x4xf32> to vector<16x16x4xf32>
    %11 = tpu.concatenate %2, %3, %4, %5, %6, %7, %8, %9, %10 in 2 : vector<16x16x4xf32>, vector<16x16x4xf32>, vector<16x16x4xf32>, vector<16x16x4xf32>, vector<16x16x4xf32>, vector<16x16x4xf32>, vector<16x16x4xf32>, vector<16x16x4xf32>, vector<16x16x4xf32> -> vector<16x16x36xf32>
    %12 = vector.shape_cast %11 : vector<16x16x36xf32> to vector<256x36xf32>
    %13 = arith.truncf %12 : vector<256x36xf32> to vector<256x36xbf16>
    %c0_4 = arith.constant 0 : index
    %c0_5 = arith.constant 0 : index
    %14 = vector.load %arg3[%c0_4, %c0_5] : memref<8x36xbf16, #tpu.memory_space<vmem>>, vector<8x36xbf16>
    %cst = arith.constant dense<0.000000e+00> : vector<8x256xf32>
    %15 = tpu.matmul %14, %13, %cst {dimension_numbers = #tpu.dot_dimension_numbers<[1], [1], [0], [0], [0, 0, 1, 0], [], []>} : vector<8x36xbf16>, vector<256x36xbf16>, vector<8x256xf32> -> vector<8x256xf32>
    %c0_6 = arith.constant 0 : index
    %c0_7 = arith.constant 0 : index
    %16 = vector.load %arg4[%c0_6, %c0_7] : memref<8x1xf32, #tpu.memory_space<vmem>>, vector<8x1xf32>
    %17 = vector.broadcast %16 : vector<8x1xf32> to vector<8x256xf32>
    %18 = arith.addf %15, %17 : vector<8x256xf32>
    %cst_8 = arith.constant 0.000000e+00 : f32
    %19 = vector.broadcast %cst_8 : f32 to vector<8x256xf32>
    %20 = arith.maximumf %18, %19 : vector<8x256xf32>
    %c0_9 = arith.constant 0 : index
    %c0_10 = arith.constant 0 : index
    %c0_11 = arith.constant 0 : index
    %21 = vector.load %arg5[%c0_9, %c0_10, %c0_11] : memref<1x8x256xf32, #tpu.memory_space<vmem>>, vector<1x8x256xf32>
    %22 = vector.shape_cast %21 : vector<1x8x256xf32> to vector<8x256xf32>
    %23 = vector.shape_cast %20 : vector<8x256xf32> to vector<1x8x256xf32>
    tpu.vector_store %arg5[%c0_9, %c0_10, %c0_11], %23 {strides = array<i32>} : memref<1x8x256xf32, #tpu.memory_space<vmem>>, vector<1x8x256xf32>,
    return
  }
  func.func @transform_0(%arg0: i32, %arg1: i32) -> (i32, i32, i32, i32, i32) {
    %c0_i32 = arith.constant 0 : i32
    %c0_i32_0 = arith.constant 0 : i32
    %c0_i32_1 = arith.constant 0 : i32
    %c0_i32_2 = arith.constant 0 : i32
    return %arg0, %arg1, %c0_i32, %c0_i32_0, %c0_i32_1 : i32, i32, i32, i32, i32
  }
  func.func @transform_1(%arg0: i32, %arg1: i32) -> (i32, i32) {
    %c0_i32 = arith.constant 0 : i32
    %c0_i32_0 = arith.constant 0 : i32
    %c0_i32_1 = arith.constant 0 : i32
    return %c0_i32, %c0_i32_0 : i32, i32
  }
  func.func @transform_2(%arg0: i32, %arg1: i32) -> (i32, i32) {
    %c0_i32 = arith.constant 0 : i32
    %c0_i32_0 = arith.constant 0 : i32
    %c0_i32_1 = arith.constant 0 : i32
    return %c0_i32, %c0_i32_0 : i32, i32
  }
  func.func @transform_3(%arg0: i32, %arg1: i32) -> (i32, i32, i32) {
    %c0_i32 = arith.constant 0 : i32
    %c0_i32_0 = arith.constant 0 : i32
    return %arg0, %c0_i32, %arg1 : i32, i32, i32
  }
}

</mosaic_0001>

<bundles_post_ra>
// kernel: tpu_custom_call.1
= control target key start
LH: loop header
LB: loop body
LE: loop exit
PB: predicated region body
PF: predicated region fallthrough
CT: control target
= control target key end

     0   :  { %8 = vsyncpa [#allocation3], 0  ;;  %s3977_s0 = inlined_call_operand.vmem [shape: f32[2,1,18,18,4], index: 0, kind: input, shape index: {}]   ;;  %s3978_s1 = inlined_call_operand.vmem [shape: bf16[8,36], index: 1, kind: input, shape index: {}]   ;;  %s3979_s2 = inlined_call_operand.vmem [shape: f32[8,1], index: 2, kind: input, shape index: {}]   ;;  %s3980_s3 = inlined_call_operand.hbm [shape: f32[2,8,256], index: 3, kind: output, shape index: {}]  }
   0x1   :  { %10 = vsyncpa [#allocation3 + $0x1], 0  ;;  %s2609_s12 = smov 0   ;;  %s2611_s13 = smov 0  }
   0x2   :  { %s2613_s14 = smov 0   ;;  %s2615_s15 = smov 0  }
   0x3   :  { %s2617_s16 = smov 0   ;;  %s2619_s17 = smov 0  }
   0x4 LB: > { %s1737_s18 = sadd.s32 4294967295, %s2577_s17   ;;  %s1738_s19 = sadd.s32 4294967294, %s2577_s17   ;;  %s2577_s17 = sphi %s2619_s17, %s16_s17   ;;  %s2573_s16 = sphi %s2617_s16, %s4073_s16   ;;  %s2569_s15 = sphi %s2615_s15, %s4072_s15   ;;  %s2565_s14 = sphi %s2613_s14, %s4071_s14   ;;  %s2561_s13 = sphi %s2611_s13, %s4070_s13   ;;  %s2557_s12 = sphi %s2609_s12, %s4069_s12  }
   0x5   : > { %s28_s20 = sadd.s32 1, %s2573_s16  ;;  %s107_s21 = sadd.s32 1, %s2565_s14 }
   0x6   : > { %p30_p0 = scmp.ge.s32.totalorder %s28_s20, 2  ;;  %p117_p1 = scmp.ne.s32.totalorder %s2565_s14, %s2561_s13 }
   0x7   : > { %p118_p2 = scmp.eq.s32.totalorder %s1737_s18, 1  ;;  %p123_p3 = scmp.ne.s32.totalorder %s2561_s13, %s2557_s12 }
   0x8   : > { %s4075_s20 = smov (%p30_p0, %s28_s20), 0  ;;  %p124_p5 = scmp.eq.s32.totalorder %s1738_s19, 1 }
   0x9   : > { %p2649_p4 = por %p118_p2, %p117_p1  ;;  %s102_s23 = ssub.s32 %s2573_s16, %s4075_s20 }
   0xa   : > { %p1741_p6 = scmp.ge.s32.totalorder %s2577_s17, 1  ;;  %p105_p7 = scmp.eq.s32.totalorder %s102_s23, 0 }
   0xb   : > { %p2656_p8 = por %p124_p5, %p123_p3  ;;  %p160_p9 = scmp.lt.s32.totalorder %s2577_s17, 3 }
   0xc   : > { %s2662_s25 = scalar_select %p105_p7, %s2565_s14, %s107_s21  }
   0xd   : > { %p161_p10 = pnand %p1741_p6, %p160_p9 }
   0xf   : > { %164 = sbr.rel (%p161_p10) target bundleno = 648 (0x288), region = 32 }
  0x16   : > { %p188_p11 = scmp.lt.s32.totalorder %s2569_s15, 1  ;;  %vm301_vm0 = vcmask 1046528   ;;  %s2579_s4 = smov 4   ;;  %vm478_vm1 = vcmask 1045504   ;;  %vm1257_vm2 = vcmask 31744   ;;  %vm1290_vm3 = vcmask 64512  }
  0x17   : > { %s2580_s5 = smov 8   ;;  %s2581_s6 = smov 12   ;;  %vm1323_vm4 = vcmask 97280   ;;  %vm1356_vm5 = vcmask 130048   ;;  %vm1389_vm6 = vcmask 162816   ;;  %vm1422_vm7 = vcmask 195584  }
  0x18   : > { %s189_s26 = scalar_select %p188_p11, %s2569_s15, 1  ;;  %vm1455_vm8 = vcmask 228352   ;;  %vm1488_vm9 = vcmask 261120   ;;  %vm1544_vm10 = vcmask 293888  }
  0x19   : > { %s2582_s7 = smov 16   ;;  %s2583_s8 = smov 20  }
  0x1a   : > { %s1777_s27 = smul.u32 432, %s189_s26  ;;  %s2584_s9 = smov 24  }
  0x1b   : > { %s2585_s10 = smov 28   ;;  %s2586_s11 = smov 32  }
  0x1c   : > { %s2669_s30 = scalar_lea.vmem %s3977_s0, %s1777_s27  ;;  %s185_s26 = sand.u32 1, %s2561_s13  }
  0x1d   : > { %v2672_v0 = vld [vmem:[%s2669_s30 + $0x30] sm:$0xff]  ;;  %v2675_v1 = vld [vmem:[%s2669_s30 + $0x38] sm:$0xff]  ;;  %v2678_v2 = vld [vmem:[%s2669_s30 + $0x40] sm:$0x3]  ;;  %s1742_s27 = sshll.u32 %s185_s26, 4  ;;  %s1750_s28 = sshll.u32 %s2569_s15, 8 }
  0x1e   : > { %v312_v3 = vrot.slane %v2672_v0, 1  ;;  %v313_v4 = vrot.slane %v2675_v1, 1  ;;  %v315_v5 = vrot.slane %v2678_v2, 1  ;;  %v2684_v6 = vld [vmem:[%s2669_s30] sm:$0xff]  ;;  %v2687_v7 = vld [vmem:[%s2669_s30 + $0x8] sm:$0xff]  ;;  %v2698_v12 = vld [vmem:[%s2669_s30 + $0x50] sm:$0xff] }
  0x1f   : > { %v2690_v8 = vld [vmem:[%s2669_s30 + $0x10] sm:$0x3]  ;;  %v302_v9 = vrot.slane %v2684_v6, 1  ;;  %v303_v10 = vrot.slane %v2687_v7, 1  ;;  %v2695_v11 = vld [vmem:[%s2669_s30 + $0x48] sm:$0xff]  ;;  %v2707_v17 = vld [vmem:[%s2669_s30 + $0x18] sm:$0xff] }
  0x20   : > { %v314_v13 = vsel %vm301_vm0, %v312_v3, %v313_v4  ;;  %v316_v14 = vsel %vm301_vm0, %v313_v4, %v315_v5  ;;  %v305_v15 = vrot.slane %v2690_v8, 1  ;;  %v2704_v16 = vld [vmem:[%s2669_s30 + $0x58] sm:$0x3]  ;;  %v2710_v18 = vld [vmem:[%s2669_s30 + $0x20] sm:$0xff]  ;;  %v317_v21 = vrot.slane %v2695_v11, 1  ;;  %v2742_v36 = vld [vmem:[%s2669_s30 + $0x68] sm:$0xff] }
  0x21   : > { %v2712_v19 = vpack.i.bf16 %v316_v14, %v314_v13  ;;  %v304_v20 = vsel %vm301_vm0, %v302_v9, %v303_v10  ;;  %v318_v22 = vrot.slane %v2698_v12, 1  ;;  %v2718_v23 = vld [vmem:[%s2669_s30 + $0x28] sm:$0x3]  ;;  %v2721_v24 = vld [vmem:[%s2669_s30 + $0x78] sm:$0xff]  ;;  %v2724_v25 = vld [vmem:[%s2669_s30 + $0x80] sm:$0xff]  ;;  %v320_v27 = vrot.slane %v2704_v16, 1 }
  0x22   : > { %v306_v26 = vsel %vm301_vm0, %v303_v10, %v305_v15  ;;  %v307_v28 = vrot.slane %v2707_v17, 1  ;;  %v308_v29 = vrot.slane %v2710_v18, 1  ;;  %v2731_v30 = vld [vmem:[%s2669_s30 + $0x88] sm:$0x3]  ;;  %v2734_v31 = vld [vmem:[%s2669_s30 + $0x60] sm:$0xff]  ;;  %v310_v34 = vrot.slane %v2718_v23, 1 }
  0x23   : > { %4013 = vst [vmem:[#allocation5_spill] sm:$0xff] %v2712_v19  ;;  %1853 = vrot.lane.b32.xlu1 %v2712_v19, %s2579_s4  ;;  %v1842_v32 = vpack.i.bf16 %v306_v26, %v304_v20  ;;  %v319_v33 = vsel %vm301_vm0, %v317_v21, %v318_v22  ;;  %v327_v35 = vrot.slane %v2721_v24, 1  ;;  %v2745_v37 = vld [vmem:[%s2669_s30 + $0x70] sm:$0x3]  ;;  %v321_v38 = vsel %vm301_vm0, %v318_v22, %v320_v27  ;;  %v2752_v42 = vld [vmem:[%s2669_s30 + $0xa8] sm:$0xff]  ;;  %v2770_v50 = vld [vmem:[%s2669_s30 + $0x98] sm:$0xff] }
  0x24   : > { %v309_v39 = vsel %vm301_vm0, %v307_v28, %v308_v29  ;;  %v328_v40 = vrot.slane %v2724_v25, 1  ;;  %v330_v41 = vrot.slane %v2731_v30, 1  ;;  %v2755_v43 = vld [vmem:[%s2669_s30 + $0xb0] sm:$0xff]  ;;  %v2758_v44 = vpack.i.bf16 %v321_v38, %v319_v33  ;;  %v2764_v48 = vld [vmem:[%s2669_s30 + $0xb8] sm:$0x3]  ;;  %v2791_v61 = vld [vmem:[%s2669_s30 + $0xe0] sm:$0xff] }
  0x25   : > { %1843 = vrot.lane.b32.xlu0 %v1842_v32, %s2579_s4  ;;  %v311_v45 = vsel %vm301_vm0, %v308_v29, %v310_v34  ;;  %v322_v46 = vrot.slane %v2734_v31, 1  ;;  %v323_v47 = vrot.slane %v2742_v36, 1  ;;  %v2767_v49 = vld [vmem:[%s2669_s30 + $0x90] sm:$0xff]  ;;  %v325_v54 = vrot.slane %v2745_v37, 1  ;;  %v2778_v55 = vld [vmem:[%s2669_s30 + $0xa0] sm:$0x3] }
  0x26   : > { %4014 = vst [vmem:[#allocation6_spill] sm:$0xff] %v2758_v44  ;;  %v2772_v51 = vpack.i.bf16 %v311_v45, %v309_v39  ;;  %v329_v52 = vsel %vm301_vm0, %v327_v35, %v328_v40  ;;  %v331_v53 = vsel %vm301_vm0, %v328_v40, %v330_v41  ;;  %v2781_v56 = vld [vmem:[%s2669_s30 + $0xd8] sm:$0xff]  ;;  %v337_v59 = vrot.slane %v2752_v42, 1  ;;  %v2794_v62 = vld [vmem:[%s2669_s30 + $0xe8] sm:$0x3]  ;;  %v2801_v9 = vld [vmem:[%s2669_s30 + $0xc0] sm:$0xff] }
  0x27   : > { %1858 = vrot.lane.b32.xlu1 %v2758_v44, %s2579_s4  ;;  %v2785_v57 = vpack.i.bf16 %v331_v53, %v329_v52  ;;  %v324_v58 = vsel %vm301_vm0, %v322_v46, %v323_v47  ;;  %v338_v60 = vrot.slane %v2755_v43, 1  ;;  %v326_v63 = vsel %vm301_vm0, %v323_v47, %v325_v54  ;;  %v2804_v10 = vld [vmem:[%s2669_s30 + $0xc8] sm:$0xff]  ;;  %v2814_v21 = vld [vmem:[%s2669_s30 + $0xd0] sm:$0x3]  ;;  %v2834_v39 = vld [vmem:[%s2669_s30 + $0x118] sm:$0x3] }
  0x28   : > { %4015 = vst [vmem:[#allocation7_spill] sm:$0xff] %v2772_v51  ;;  %v340_v3 = vrot.slane %v2764_v48, 1  ;;  %v332_v4 = vrot.slane %v2767_v49, 1  ;;  %v333_v5 = vrot.slane %v2770_v50, 1  ;;  %v2808_v13 = vpack.i.bf16 %v326_v63, %v324_v58  ;;  %v2821_v29 = vld [vmem:[%s2669_s30 + $0x108] sm:$0xff]  ;;  %v2824_v32 = vld [vmem:[%s2669_s30 + $0x110] sm:$0xff] }
  0x29   : > { %4016 = vst [vmem:[#allocation8_spill] sm:$0xff] %v2785_v57  ;;  %1848 = vrot.lane.b32.xlu0 %v2772_v51, %s2579_s4  ;;  %v339_v14 = vsel %vm301_vm0, %v337_v59, %v338_v60  ;;  %v335_v15 = vrot.slane %v2778_v55, 1  ;;  %v347_v20 = vrot.slane %v2781_v56, 1  ;;  %v348_v27 = vrot.slane %v2791_v61, 1  ;;  %v2837_v40 = vld [vmem:[%s2669_s30 + $0xf0] sm:$0xff]  ;;  %v2840_v41 = vld [vmem:[%s2669_s30 + $0xf8] sm:$0xff] }
  0x2a   : > { %4017 = vst [vmem:[#allocation9_spill] sm:$0xff] %v2808_v13  ;;  %v341_v22 = vsel %vm301_vm0, %v338_v60, %v340_v3  ;;  %v334_v26 = vsel %vm301_vm0, %v332_v4, %v333_v5  ;;  %v350_v28 = vrot.slane %v2794_v62, 1  ;;  %v342_v35 = vrot.slane %v2801_v9, 1  ;;  %v2846_v52 = vld [vmem:[%s2669_s30 + $0x100] sm:$0x3]  ;;  %v2849_v53 = vld [vmem:[%s2669_s30 + $0x138] sm:$0xff] }
  0x2b   : > { %1868 = vrot.lane.b32.xlu1 %v2785_v57, %s2579_s4  ;;  %v2828_v33 = vpack.i.bf16 %v341_v22, %v339_v14  ;;  %v336_v34 = vsel %vm301_vm0, %v333_v5, %v335_v15  ;;  %v343_v38 = vrot.slane %v2804_v10, 1  ;;  %v349_v45 = vsel %vm301_vm0, %v347_v20, %v348_v27  ;;  %v2859_v63 = vld [vmem:[%s2669_s30 + $0x140] sm:$0xff]  ;;  %v2862_v3 = vld [vmem:[%s2669_s30 + $0x148] sm:$0x3]  ;;  %v2901_v44 = vld [vmem:[%s2669_s30 + $0x178] sm:$0x3] }
  0x2c   : > { %v351_v46 = vsel %vm301_vm0, %v348_v27, %v350_v28  ;;  %v345_v47 = vrot.slane %v2814_v21, 1  ;;  %v2853_v54 = vpack.i.bf16 %v336_v34, %v334_v26  ;;  %v357_v59 = vrot.slane %v2821_v29, 1  ;;  %4020 = vst [vmem:[#allocation12_spill] sm:$0xff] %v2862_v3  ;;  %v2876_v28 = vld [vmem:[%s2669_s30 + $0x120] sm:$0xff]  ;;  %v2879_v34 = vld [vmem:[%s2669_s30 + $0x128] sm:$0xff]  ;;  %4025 = vst [vmem:[#allocation17_spill] sm:$0xff] %v2901_v44 }
  0x2d   : > { %4018 = vst [vmem:[#allocation10_spill] sm:$0xff] %v2828_v33  ;;  %1863 = vrot.lane.b32.xlu0 %v2808_v13, %s2579_s4  ;;  %v344_v58 = vsel %vm301_vm0, %v342_v35, %v343_v38  ;;  %v358_v60 = vrot.slane %v2824_v32, 1  ;;  %v360_v5 = vrot.slane %v2834_v39, 1  ;;  %v352_v14 = vrot.slane %v2837_v40, 1  ;;  %4022 = vst [vmem:[#allocation14_spill] sm:$0xff] %v2879_v34  ;;  %s187_s29 = scalar_lea.vmem [#allocation2], %s1742_s27 }
  0x2e   : > { %4019 = vst [vmem:[#allocation11_spill] sm:$0xff] %v2853_v54  ;;  %v346_v4 = vsel %vm301_vm0, %v343_v38, %v345_v47  ;;  %v353_v15 = vrot.slane %v2840_v41, 1  ;;  %v2870_v20 = vpack.i.bf16 %v351_v46, %v349_v45  ;;  %v355_v26 = vrot.slane %v2846_v52, 1  ;;  %v2882_v35 = vld [vmem:[%s2669_s30 + $0x130] sm:$0x3]  ;;  %v2888_v47 = vld [vmem:[%s2669_s30 + $0x168] sm:$0xff] }
  0x2f   : > { %1878 = vrot.lane.b32.xlu1 %v2828_v33, %s2579_s4  ;;  %v359_v22 = vsel %vm301_vm0, %v357_v59, %v358_v60  ;;  %v367_v27 = vrot.slane %v2849_v53, 1  ;;  %4023 = vst [vmem:[#allocation15_spill] sm:$0xff] %v2882_v35  ;;  %v361_v38 = vsel %vm301_vm0, %v358_v60, %v360_v5  ;;  %v368_v45 = vrot.slane %v2859_v63, 1  ;;  %v2891_v59 = vld [vmem:[%s2669_s30 + $0x170] sm:$0xff]  ;;  %v2907_v5 = vld [vmem:[%s2669_s30 + $0x158] sm:$0xff]  ;;  %s1642_s15 = scalar_lea.sflag [#allocation3], %s185_s26 }
  0x30   : > { %4021 = vst [vmem:[#allocation13_spill] sm:$0xff] %v2870_v20  ;;  %v370_v46 = vrot.slane %v2862_v3, 1  ;;  %v2895_v33 = vpack.i.bf16 %v346_v4, %v344_v58  ;;  %v2897_v57 = vpack.i.bf16 %v361_v38, %v359_v22  ;;  %v354_v13 = vsel %vm301_vm0, %v352_v14, %v353_v15  ;;  %v2904_v60 = vld [vmem:[%s2669_s30 + $0x150] sm:$0xff]  ;;  %4026 = vst [vmem:[#allocation18_spill] sm:$0xff] %v2907_v5  ;;  %v2914_v58 = vld [vmem:[%s2669_s30 + $0x160] sm:$0x3] }
  0x31   : > { %1873 = vrot.lane.b32.xlu0 %v2853_v54, %s2579_s4  ;;  %v356_v19 = vsel %vm301_vm0, %v353_v15, %v355_v26  ;;  %v362_v51 = vrot.slane %v2876_v28, 1  ;;  %v363_v3 = vrot.slane %v2879_v34, 1  ;;  %v365_v54 = vrot.slane %v2882_v35, 1 }
  0x32   : > { %4024 = vst [vmem:[#allocation16_spill] sm:$0xff] %v2895_v33  ;;  %v369_v4 = vsel %vm301_vm0, %v367_v27, %v368_v45  ;;  %v371_v14 = vsel %vm301_vm0, %v368_v45, %v370_v46  ;;  %v377_v22 = vrot.slane %v2888_v47, 1  ;;  %v378_v38 = vrot.slane %v2891_v59, 1 }
  0x33   : > { %1888 = vrot.lane.b32.xlu1 %v2870_v20, %s2579_s4  ;;  %v380_v15 = vrot.slane %v2901_v44, 1  ;;  %v372_v26 = vrot.slane %v2904_v60, 1  ;;  %v373_v34 = vrot.slane %v2907_v5, 1  ;;  %v2927_v35 = vpack.i.bf16 %v356_v19, %v354_v13 }
  0x34   : > { %v375_v20 = vrot.slane %v2914_v58, 1  ;;  %v2930_v27 = vpack.i.bf16 %v371_v14, %v369_v4  ;;  %v364_v45 = vsel %vm301_vm0, %v362_v51, %v363_v3  ;;  %v366_v46 = vsel %vm301_vm0, %v363_v3, %v365_v54 }
  0x35   : > { %1883 = vrot.lane.b32.xlu0 %v2895_v33, %s2579_s4  ;;  %v379_v44 = vsel %vm301_vm0, %v377_v22, %v378_v38  ;;  %v381_v5 = vsel %vm301_vm0, %v378_v38, %v380_v15  ;;  %v374_v33 = vsel %vm301_vm0, %v372_v26, %v373_v34  ;;  %v484_v19 = vrot.slane %v2707_v17, 2 }
  0x36   : > { %v485_v13 = vrot.slane %v2710_v18, 2  ;;  %v376_v4 = vsel %vm301_vm0, %v373_v34, %v375_v20  ;;  %v487_v14 = vrot.slane %v2718_v23, 2  ;;  %v479_v51 = vrot.slane %v2684_v6, 2 }
  0x37   : > { %1898 = vrot.lane.b32.xlu1 %v2897_v57, %s2579_s4  ;;  %v480_v54 = vrot.slane %v2687_v7, 2  ;;  %v482_v3 = vrot.slane %v2690_v8, 2  ;;  %v2948_v22 = vpack.i.bf16 %v366_v46, %v364_v45  ;;  %v494_v38 = vrot.slane %v2695_v11, 2 }
  0x38   : > { %v495_v15 = vrot.slane %v2698_v12, 2  ;;  %v497_v26 = vrot.slane %v2704_v16, 2  ;;  %v492_v20 = vrot.slane %v2678_v2, 2  ;;  %v2956_v6 = vpack.i.bf16 %v381_v5, %v379_v44 }
  0x39   : > { %1893 = vrot.lane.b32.xlu0 %v2927_v35, %s2579_s4  ;;  %v2958_v7 = vpack.i.bf16 %v376_v4, %v374_v33  ;;  %v486_v8 = vsel %vm478_vm1, %v484_v19, %v485_v13  ;;  %v488_v23 = vsel %vm478_vm1, %v485_v13, %v487_v14  ;;  %v481_v34 = vsel %vm478_vm1, %v479_v51, %v480_v54 }
  0x3a   : > { %4027 = vst [vmem:[#allocation19_spill] sm:$0xff] %v2956_v6  ;;  %v489_v45 = vrot.slane %v2672_v0, 2  ;;  %v490_v46 = vrot.slane %v2675_v1, 2  ;;  %v483_v2 = vsel %vm478_vm1, %v480_v54, %v482_v3  ;;  %v504_v16 = vrot.slane %v2721_v24, 2 }
  0x3b   : > { %1908 = vrot.lane.b32.xlu1 %v2930_v27, %s2579_s4  ;;  %4028 = vst [vmem:[#allocation20_spill] sm:$0xff] %v2958_v7  ;;  %v505_v44 = vrot.slane %v2724_v25, 2  ;;  %v507_v33 = vrot.slane %v2731_v30, 2  ;;  %v496_v5 = vsel %vm478_vm1, %v494_v38, %v495_v15  ;;  %v498_v19 = vsel %vm478_vm1, %v495_v15, %v497_v26 }
  0x3c   : > { %v2975_v13 = vpack.i.bf16 %v488_v23, %v486_v8  ;;  %v499_v4 = vrot.slane %v2734_v31, 2  ;;  %v500_v14 = vrot.slane %v2742_v36, 2  ;;  %v502_v51 = vrot.slane %v2745_v37, 2 }
  0x3d   : > { %1903 = vrot.lane.b32.xlu0 %v2948_v22, %s2579_s4  ;;  %v1922_v54 = vpack.i.bf16 %v483_v2, %v481_v34  ;;  %v491_v3 = vsel %vm478_vm1, %v489_v45, %v490_v46  ;;  %v2983_v30 = vpack.i.bf16 %v498_v19, %v496_v5  ;;  %v493_v38 = vsel %vm478_vm1, %v490_v46, %v492_v20 }
  0x3e   : > { %v506_v15 = vsel %vm478_vm1, %v504_v16, %v505_v44  ;;  %v508_v26 = vsel %vm478_vm1, %v505_v44, %v507_v33  ;;  %v514_v8 = vrot.slane %v2752_v42, 2  ;;  %v515_v23 = vrot.slane %v2755_v43, 2 }
  0x3f   : > { %1918 = vrot.lane.b32.xlu1 %v2956_v6, %s2579_s4  ;;  %v517_v37 = vrot.slane %v2764_v48, 2  ;;  %v509_v34 = vrot.slane %v2767_v49, 2  ;;  %v501_v45 = vsel %vm478_vm1, %v499_v4, %v500_v14  ;;  %v503_v20 = vsel %vm478_vm1, %v500_v14, %v502_v51 }
  0x40   : > { %v510_v46 = vrot.slane %v2770_v50, 2  ;;  %v512_v2 = vrot.slane %v2778_v55, 2  ;;  %v2999_v16 = vpack.i.bf16 %v493_v38, %v491_v3  ;;  %v3001_v44 = vpack.i.bf16 %v508_v26, %v506_v15 }
  0x41   : > { %1913 = vrot.lane.b32.xlu0 %v2958_v7, %s2579_s4  ;;  %v3003_v48 = vpack.i.bf16 %v503_v20, %v501_v45  ;;  %v524_v33 = vrot.slane %v2781_v56, 2  ;;  %v516_v5 = vsel %vm478_vm1, %v514_v8, %v515_v23  ;;  %v518_v19 = vsel %vm478_vm1, %v515_v23, %v517_v37  ;;  %v4030_v20 = vld [vmem:[#allocation12_spill] sm:$0xff] }
  0x42   : > { %4029 = vst [vmem:[#allocation21_spill] sm:$0xff] %v3001_v44  ;;  %v511_v4 = vsel %vm478_vm1, %v509_v34, %v510_v46  ;;  %v513_v55 = vsel %vm478_vm1, %v510_v46, %v512_v2  ;;  %v525_v14 = vrot.slane %v2791_v61, 2  ;;  %v527_v51 = vrot.slane %v2794_v62, 2 }
  0x43   : > { %1928 = vrot.lane.b32.xlu1 %v2975_v13, %s2580_s5  ;;  %v520_v3 = vrot.slane %v2804_v10, 2  ;;  %v522_v38 = vrot.slane %v2814_v21, 2  ;;  %v534_v15 = vrot.slane %v2821_v29, 2  ;;  %v535_v26 = vrot.slane %v2824_v32, 2 }
  0x44   : > { %v537_v8 = vrot.slane %v2834_v39, 2  ;;  %v529_v23 = vrot.slane %v2837_v40, 2  ;;  %v530_v37 = vrot.slane %v2840_v41, 2  ;;  %v532_v62 = vrot.slane %v2846_v52, 2 }
  0x45   : > { %1923 = vrot.lane.b32.xlu0 %v1922_v54, %s2580_s5  ;;  %v519_v54 = vrot.slane %v2801_v9, 2  ;;  %v3027_v34 = vpack.i.bf16 %v518_v19, %v516_v5  ;;  %v544_v45 = vrot.slane %v2849_v53, 2  ;;  %v545_v21 = vrot.slane %v2859_v63, 2 }
  0x46   : > { %v547_v46 = vrot.slane %v4030_v20, 2  ;;  %v3032_v2 = vpack.i.bf16 %v513_v55, %v511_v4  ;;  %v526_v39 = vsel %vm478_vm1, %v524_v33, %v525_v14  ;;  %v528_v6 = vsel %vm478_vm1, %v525_v14, %v527_v51  ;;  %v4031_v33 = vld [vmem:[#allocation14_spill] sm:$0xff] }
  0x47   : > { %1938 = vrot.lane.b32.xlu1 %v2983_v30, %s2580_s5  ;;  %v521_v52 = vsel %vm478_vm1, %v519_v54, %v520_v3  ;;  %v523_v5 = vsel %vm478_vm1, %v520_v3, %v522_v38  ;;  %v536_v19 = vsel %vm478_vm1, %v534_v15, %v535_v26  ;;  %v538_v7 = vsel %vm478_vm1, %v535_v26, %v537_v8  ;;  %v4032_v3 = vld [vmem:[#allocation15_spill] sm:$0xff] }
  0x48   : > { %v533_v4 = vsel %vm478_vm1, %v530_v37, %v532_v62  ;;  %v539_v55 = vrot.slane %v2876_v28, 2  ;;  %v540_v20 = vrot.slane %v4031_v33, 2  ;;  %v3048_v14 = vpack.i.bf16 %v528_v6, %v526_v39  ;;  %v4034_v39 = vld [vmem:[#allocation18_spill] sm:$0xff] }
  0x49   : > { %1933 = vrot.lane.b32.xlu0 %v2999_v16, %s2580_s5  ;;  %v546_v51 = vsel %vm478_vm1, %v544_v45, %v545_v21  ;;  %v548_v54 = vsel %vm478_vm1, %v545_v21, %v547_v46  ;;  %v542_v38 = vrot.slane %v4032_v3, 2  ;;  %v3053_v15 = vpack.i.bf16 %v523_v5, %v521_v52  ;;  %v4033_v21 = vld [vmem:[#allocation17_spill] sm:$0xff] }
  0x4a   : > { %v3057_v26 = vpack.i.bf16 %v538_v7, %v536_v19  ;;  %v555_v6 = vrot.slane %v2891_v59, 2  ;;  %v541_v62 = vsel %vm478_vm1, %v539_v55, %v540_v20  ;;  %v557_v46 = vrot.slane %v4033_v21, 2 }
  0x4b   : > { %1948 = vrot.lane.b32.xlu1 %v3001_v44, %s2580_s5  ;;  %v531_v44 = vsel %vm478_vm1, %v529_v23, %v530_v37  ;;  %v554_v23 = vrot.slane %v2888_v47, 2  ;;  %v3063_v37 = vpack.i.bf16 %v548_v54, %v546_v51  ;;  %v543_v45 = vsel %vm478_vm1, %v540_v20, %v542_v38 }
  0x4c   : > { %v3059_v8 = vpack.i.bf16 %v533_v4, %v531_v44  ;;  %v549_v7 = vrot.slane %v2904_v60, 2  ;;  %v550_v44 = vrot.slane %v4034_v39, 2  ;;  %v552_v52 = vrot.slane %v2914_v58, 2 }
  0x4d   : > { %1943 = vrot.lane.b32.xlu0 %v3003_v48, %s2580_s5  ;;  %v3077_v5 = vpack.i.bf16 %v543_v45, %v541_v62  ;;  %v556_v19 = vsel %vm478_vm1, %v554_v23, %v555_v6  ;;  %v558_v4 = vsel %vm478_vm1, %v555_v6, %v557_v46  ;;  %v2007_v54 = vpack.i.bf16 %v2675_v1, %v2672_v0 }
  0x4e   : > { %v551_v55 = vsel %vm478_vm1, %v549_v7, %v550_v44  ;;  %v553_v20 = vsel %vm478_vm1, %v550_v44, %v552_v52  ;;  %v3087_v58 = vpack.i.bf16 %v558_v4, %v556_v19  ;;  %v2002_v3 = vpack.i.bf16 %v2710_v18, %v2707_v17 }
  0x4f   : > { %1958 = vrot.lane.b32.xlu1 %v3027_v34, %s2580_s5  ;;  %v3091_v51 = vpack.i.bf16 %v553_v20, %v551_v55  ;;  %v2017_v38 = vpack.i.bf16 %v2742_v36, %v2734_v31  ;;  %v2012_v23 = vpack.i.bf16 %v2698_v12, %v2695_v11  ;;  %v3110_v0 = vpack.i.bf16 %v2770_v50, %v2767_v49 }
  0x50   : > { %v3115_v1 = vpack.i.bf16 %v2724_v25, %v2721_v24  ;;  %v3121_v17 = vpack.i.bf16 %v2804_v10, %v2801_v9  ;;  %v3127_v11 = vpack.i.bf16 %v2755_v43, %v2752_v42  ;;  %v2047_v12 = vpack.i.bf16 %v2840_v41, %v2837_v40  ;;  %v4035_v10 = vld [vmem:[#allocation7_spill] sm:$0xff]  ;;  %v4036_v40 = vld [vmem:[#allocation13_spill] sm:$0xff] }
  0x51   : > { %1953 = vrot.lane.b32.xlu0 %v3032_v2, %s2580_s5  ;;  %v2042_v18 = vpack.i.bf16 %v2791_v61, %v2781_v56  ;;  %v2052_v9 = vpack.i.bf16 %v2824_v32, %v2821_v29  ;;  %v4037_v56 = vld [vmem:[#allocation5_spill] sm:$0xff]  ;;  %v4038_v32 = vld [vmem:[#allocation6_spill] sm:$0xff]  ;;  %v2182_v46 = vpack.i.bf16 %v4031_v33, %v2876_v28 }
  0x53   : > { %1968 = vrot.lane.b32.xlu1 %v3048_v14, %s2580_s5 }
  0x55   : > { %1963 = vrot.lane.b32.xlu0 %v3053_v15, %s2580_s5 }
  0x57   : > { %1978 = vrot.lane.b32.xlu1 %v3057_v26, %s2580_s5 }
  0x59   : > { %1973 = vrot.lane.b32.xlu0 %v3059_v8, %s2580_s5 }
  0x5b   : > { %1988 = vrot.lane.b32.xlu1 %v3063_v37, %s2580_s5 }
  0x5d   : > { %1983 = vrot.lane.b32.xlu0 %v3077_v5, %s2580_s5 }
  0x5f   : > { %1998 = vrot.lane.b32.xlu1 %v3087_v58, %s2580_s5 }
  0x61   : > { %1993 = vrot.lane.b32.xlu0 %v3091_v51, %s2580_s5 }
  0x63   : > { %2008 = vrot.lane.b32.xlu1 %v2007_v54, %s2581_s6 }
  0x65   : > { %2003 = vrot.lane.b32.xlu0 %v2002_v3, %s2581_s6 }
  0x67   : > { %2018 = vrot.lane.b32.xlu1 %v2017_v38, %s2581_s6 }
  0x69   : > { %2013 = vrot.lane.b32.xlu0 %v2012_v23, %s2581_s6 }
  0x6b   : > { %2028 = vrot.lane.b32.xlu1 %v3110_v0, %s2581_s6 }
  0x6d   : > { %2023 = vrot.lane.b32.xlu0 %v3115_v1, %s2581_s6 }
  0x6f   : > { %2038 = vrot.lane.b32.xlu1 %v3121_v17, %s2581_s6 }
  0x71   : > { %2033 = vrot.lane.b32.xlu0 %v3127_v11, %s2581_s6 }
  0x73   : > { %2048 = vrot.lane.b32.xlu1 %v2047_v12, %s2581_s6 }
  0x75   : > { %2043 = vrot.lane.b32.xlu0 %v2042_v18, %s2581_s6 }
  0x77   : > { %2058 = vrot.lane.b32.xlu1 %v4035_v10, %s2582_s7 }
  0x79   : > { %2053 = vrot.lane.b32.xlu0 %v2052_v9, %s2581_s6 }
  0x7b   : > { %2068 = vrot.lane.b32.xlu1 %v2975_v13, %s2583_s8 }
  0x7d   : > { %2063 = vrot.lane.b32.xlu0 %v4036_v40, %s2582_s7 }
  0x7f   : > { %2078 = vrot.lane.b32.xlu1 %v2007_v54, %s2584_s9 }
  0x81   : > { %2073 = vrot.lane.b32.xlu0 %v3048_v14, %s2583_s8 }
  0x83   : > { %2088 = vrot.lane.b32.xlu1 %v4037_v56, %s2585_s10 }
  0x85   : > { %2083 = vrot.lane.b32.xlu0 %v2047_v12, %s2584_s9 }
  0x87   : > { %2098 = vrot.lane.b32.xlu1 %v2999_v16, %s2586_s11 }
  0x89   : > { %2093 = vrot.lane.b32.xlu0 %v2927_v35, %s2585_s10 }
  0x8b   : > { %2108 = vrot.lane.b32.xlu1 %v4037_v56, %s2582_s7 }
  0x8d   : > { %2103 = vrot.lane.b32.xlu0 %v3059_v8, %s2586_s11 }
  0x8f   : > { %2118 = vrot.lane.b32.xlu1 %v2999_v16, %s2583_s8 }
  0x91   : > { %2113 = vrot.lane.b32.xlu0 %v2927_v35, %s2582_s7 }
  0x93   : > { %2128 = vrot.lane.b32.xlu1 %v2012_v23, %s2584_s9 }
  0x95   : > { %2123 = vrot.lane.b32.xlu0 %v3059_v8, %s2583_s8  ;;  %v3169_v61 = vpop.permute.xlu1 %1853 }
  0x97   : > { %v3171_v29 = vpop.permute.xlu0 %1843  ;;  %2138 = vrot.lane.b32.xlu1 %v4038_v32, %s2585_s10 }
  0x99   : > { %2133 = vrot.lane.b32.xlu0 %v2052_v9, %s2584_s9  ;;  %v3176_v41 = vpop.permute.xlu1 %1858 }
  0x9b   : > { %v3178_v13 = vpop.permute.xlu0 %1848  ;;  %2148 = vrot.lane.b32.xlu1 %v2983_v30, %s2586_s11 }
  0x9d   : > { %2143 = vrot.lane.b32.xlu0 %v2897_v57, %s2585_s10  ;;  %v1869_v35 = vpop.permute.xlu1 %1868 }
  0x9e   : > { %v1871_v20 = vunpack.i.h.bf16 %v1869_v35  ;;  %v1870_v54 = vunpack.i.l.bf16 %v1869_v35 }
  0x9f   : > { %v1864_v16 = vpop.permute.xlu0 %1863  ;;  %2158 = vrot.lane.b32.xlu1 %v4038_v32, %s2582_s7 }
  0xa0   : > { %v1866_v23 = vunpack.i.h.bf16 %v1864_v16  ;;  %v1865_v12 = vunpack.i.l.bf16 %v1864_v16  ;;  %v1269_v10 = vsel %vm1257_vm2, %v2724_v25, %v1871_v20  ;;  %v1268_v56 = vsel %vm1257_vm2, %v2721_v24, %v1870_v54 }
  0xa1   : > { %2153 = vrot.lane.b32.xlu0 %v3057_v26, %s2586_s11  ;;  %v1879_v8 = vpop.permute.xlu1 %1878 }
  0xa2   : > { %v1880_v32 = vunpack.i.l.bf16 %v1879_v8  ;;  %v1266_v25 = vsel %vm1257_vm2, %v2734_v31, %v1865_v12 }
  0xa3   : > { %v3188_v6 = vpop.permute.xlu0 %1873  ;;  %2168 = vrot.lane.b32.xlu1 %v2983_v30, %s2583_s8  ;;  %v4039_v30 = vld [vmem:[#allocation9_spill] sm:$0xff] }
  0xa4   : > { %v1876_v24 = vunpack.i.h.bf16 %v3188_v6  ;;  %v1272_v31 = vsel %vm1257_vm2, %v2752_v42, %v1880_v32  ;;  %v4040_v42 = vld [vmem:[#allocation8_spill] sm:$0xff] }
  0xa5   : > { %2163 = vrot.lane.b32.xlu0 %v2897_v57, %s2582_s7  ;;  %v3194_v62 = vpop.permute.xlu1 %1888 }
  0xa7   : > { %v3196_v45 = vpop.permute.xlu0 %1883  ;;  %2178 = vrot.lane.b32.xlu1 %v2017_v38, %s2584_s9  ;;  %v2237_v38 = vpack.i.bf16 %v2859_v63, %v2849_v53 }
  0xa9   : > { %2173 = vrot.lane.b32.xlu0 %v3057_v26, %s2583_s8  ;;  %v3201_v21 = vpop.permute.xlu1 %1898 }
  0xab   : > { %v3205_v7 = vpop.permute.xlu0 %1893  ;;  %2188 = vrot.lane.b32.xlu1 %v4039_v30, %s2585_s10 }
  0xad   : > { %2183 = vrot.lane.b32.xlu0 %v2182_v46, %s2584_s9  ;;  %v3210_v57 = vpop.permute.xlu1 %1908 }
  0xaf   : > { %v3212_v44 = vpop.permute.xlu0 %1903  ;;  %2198 = vrot.lane.b32.xlu1 %v3003_v48, %s2586_s11 }
  0xb1   : > { %2193 = vrot.lane.b32.xlu0 %v2948_v22, %s2585_s10  ;;  %v3218_v26 = vpop.permute.xlu1 %1918 }
  0xb3   : > { %v3220_v52 = vpop.permute.xlu0 %1913  ;;  %2208 = vrot.lane.b32.xlu1 %v2182_v46, %s2581_s6 }
  0xb5   : > { %2203 = vrot.lane.b32.xlu0 %v3077_v5, %s2586_s11  ;;  %v3225_v19 = vpop.permute.xlu1 %1928 }
  0xb7   : > { %v3227_v4 = vpop.permute.xlu0 %1923  ;;  %2218 = vrot.lane.b32.xlu1 %v2948_v22, %s2582_s7 }
  0xb9   : > { %2213 = vrot.lane.b32.xlu0 %v4039_v30, %s2582_s7  ;;  %v3233_v55 = vpop.permute.xlu1 %1938 }
  0xbb   : > { %v3235_v3 = vpop.permute.xlu0 %1933  ;;  %2228 = vrot.lane.b32.xlu1 %v3077_v5, %s2583_s8  ;;  %v1881_v5 = vunpack.i.h.bf16 %v1879_v8  ;;  %v1875_v8 = vunpack.i.l.bf16 %v3188_v6 }
  0xbd   : > { %2223 = vrot.lane.b32.xlu0 %v3003_v48, %s2583_s8  ;;  %v1949_v22 = vpop.permute.xlu1 %1948 }
  0xbe   : > { %v1951_v18 = vunpack.i.h.bf16 %v1949_v22  ;;  %v1950_v9 = vunpack.i.l.bf16 %v1949_v22  ;;  %v1267_v22 = vsel %vm1257_vm2, %v2742_v36, %v1866_v23  ;;  %v1273_v36 = vsel %vm1257_vm2, %v2755_v43, %v1881_v5 }
  0xbf   : > { %v1944_v35 = vpop.permute.xlu0 %1943  ;;  %2238 = vrot.lane.b32.xlu1 %v2237_v38, %s2584_s9  ;;  %v1270_v43 = vsel %vm1257_vm2, %v2767_v49, %v1875_v8  ;;  %v1906_v8 = vunpack.i.h.bf16 %v3212_v44 }
  0xc0   : > { %v3249_v16 = vsel %vm1290_vm3, %v1269_v10, %v1951_v18  ;;  %v3252_v48 = vsel %vm1290_vm3, %v1268_v56, %v1950_v9  ;;  %v1946_v46 = vunpack.i.h.bf16 %v1944_v35  ;;  %v1945_v30 = vunpack.i.l.bf16 %v1944_v35 }
  0xc1   : > { %2233 = vrot.lane.b32.xlu0 %v3115_v1, %s2584_s9  ;;  %v1959_v20 = vpop.permute.xlu1 %1958  ;;  %v1271_v35 = vsel %vm1257_vm2, %v2770_v50, %v1876_v24  ;;  %v4041_v50 = vld [vmem:[#allocation21_spill] sm:$0xff] }
  0xc2   : > { %v3263_v54 = vsel %vm1290_vm3, %v1266_v25, %v1945_v30  ;;  %v3266_v18 = vsel %vm1290_vm3, %v1267_v22, %v1946_v46  ;;  %v1961_v9 = vunpack.i.h.bf16 %v1959_v20  ;;  %v1960_v10 = vunpack.i.l.bf16 %v1959_v20 }
  0xc3   : > { %v1954_v23 = vpop.permute.xlu0 %1953  ;;  %2248 = vrot.lane.b32.xlu1 %v2930_v27, %s2585_s10  ;;  %v1911_v22 = vunpack.i.h.bf16 %v3210_v57  ;;  %v1910_v25 = vunpack.i.l.bf16 %v3210_v57  ;;  %v1905_v20 = vunpack.i.l.bf16 %v3212_v44 }
  0xc4   : > { %v3275_v1 = vsel %vm1290_vm3, %v1273_v36, %v1961_v9  ;;  %v3278_v6 = vsel %vm1290_vm3, %v1272_v31, %v1960_v10  ;;  %v1956_v12 = vunpack.i.h.bf16 %v1954_v23  ;;  %v1955_v56 = vunpack.i.l.bf16 %v1954_v23 }
  0xc5   : > { %2243 = vrot.lane.b32.xlu0 %v4040_v42, %s2585_s10  ;;  %v3286_v5 = vpop.permute.xlu1 %1968  ;;  %v1285_v31 = vsel %vm1257_vm2, %v2859_v63, %v1911_v22  ;;  %v1284_v57 = vsel %vm1257_vm2, %v2849_v53, %v1910_v25  ;;  %v1921_v23 = vunpack.i.h.bf16 %v3218_v26  ;;  %v1283_v63 = vsel %vm1257_vm2, %v4031_v33, %v1906_v8 }
  0xc6   : > { %v3289_v32 = vsel %vm1290_vm3, %v1270_v43, %v1955_v56  ;;  %v3292_v46 = vsel %vm1290_vm3, %v1271_v35, %v1956_v12  ;;  %v1920_v12 = vunpack.i.l.bf16 %v3218_v26  ;;  %v1282_v53 = vsel %vm1257_vm2, %v2876_v28, %v1905_v20 }
  0xc7   : > { %v3294_v30 = vpop.permute.xlu0 %1963  ;;  %2258 = vrot.lane.b32.xlu1 %v3063_v37, %s2586_s11  ;;  %v1916_v26 = vunpack.i.h.bf16 %v3220_v52  ;;  %v1289_v33 = vsel %vm1257_vm2, %v2891_v59, %v1921_v23 }
  0xc8   : > { %v1288_v28 = vsel %vm1257_vm2, %v2888_v47, %v1920_v12 }
  0xc9   : > { %2253 = vrot.lane.b32.xlu0 %v4041_v50, %s2586_s11  ;;  %v3300_v49 = vpop.permute.xlu1 %1978 }
  0xcb   : > { %v3304_v24 = vpop.permute.xlu0 %1973  ;;  %2268 = vrot.lane.b32.xlu1 %v4040_v42, %s2582_s7  ;;  %v1915_v42 = vunpack.i.l.bf16 %v3220_v52 }
  0xcd   : > { %2263 = vrot.lane.b32.xlu0 %v2237_v38, %s2581_s6  ;;  %v1989_v9 = vpop.permute.xlu1 %1988 }
  0xce   : > { %v1991_v10 = vunpack.i.h.bf16 %v1989_v9  ;;  %v1990_v36 = vunpack.i.l.bf16 %v1989_v9 }
  0xcf   : > { %v1984_v56 = vpop.permute.xlu0 %1983  ;;  %2278 = vrot.lane.b32.xlu1 %v4041_v50, %s2583_s8 }
  0xd0   : > { %v3320_v44 = vsel %vm1290_vm3, %v1285_v31, %v1991_v10  ;;  %v3323_v38 = vsel %vm1290_vm3, %v1284_v57, %v1990_v36  ;;  %v1986_v35 = vunpack.i.h.bf16 %v1984_v56  ;;  %v1985_v43 = vunpack.i.l.bf16 %v1984_v56 }
  0xd1   : > { %4042 = vst [vmem:[#allocation12_spill] sm:$0xff] %v3323_v38  ;;  %2273 = vrot.lane.b32.xlu0 %v2930_v27, %s2582_s7  ;;  %v1999_v50 = vpop.permute.xlu1 %1998  ;;  %v1287_v31 = vsel %vm1257_vm2, %v4034_v39, %v1916_v26  ;;  %v1286_v57 = vsel %vm1257_vm2, %v2904_v60, %v1915_v42 }
  0xd2   : > { %v3334_v22 = vsel %vm1290_vm3, %v1282_v53, %v1985_v43  ;;  %v3337_v25 = vsel %vm1290_vm3, %v1283_v63, %v1986_v35  ;;  %v2001_v9 = vunpack.i.h.bf16 %v1999_v50  ;;  %v2000_v10 = vunpack.i.l.bf16 %v1999_v50  ;;  %v4047_v43 = vld [vmem:[#allocation11_spill] sm:$0xff] }
  0xd3   : > { %v1994_v8 = vpop.permute.xlu0 %1993  ;;  %2288 = vrot.lane.b32.xlu1 %v3110_v0, %s2584_s9  ;;  %v2292_v0 = vpack.i.bf16 %v4034_v39, %v2904_v60  ;;  %v4048_v60 = vld [vmem:[#allocation20_spill] sm:$0xff] }
  0xd4   : > { %v3346_v27 = vsel %vm1290_vm3, %v1289_v33, %v2001_v9  ;;  %v3349_v52 = vsel %vm1290_vm3, %v1288_v28, %v2000_v10  ;;  %v1996_v20 = vunpack.i.h.bf16 %v1994_v8  ;;  %v1995_v36 = vunpack.i.l.bf16 %v1994_v8 }
  0xd5   : > { %4043 = vst [vmem:[#allocation14_spill] sm:$0xff] %v3346_v27  ;;  %4044 = vst [vmem:[#allocation15_spill] sm:$0xff] %v3349_v52  ;;  %2283 = vrot.lane.b32.xlu0 %v3063_v37, %s2583_s8  ;;  %v3357_v23 = vpop.permute.xlu1 %2008 }
  0xd6   : > { %v3362_v12 = vsel %vm1290_vm3, %v1286_v57, %v1995_v36  ;;  %v3365_v56 = vsel %vm1290_vm3, %v1287_v31, %v1996_v20 }
  0xd7   : > { %4045 = vst [vmem:[#allocation17_spill] sm:$0xff] %v3362_v12  ;;  %4046 = vst [vmem:[#allocation18_spill] sm:$0xff] %v3365_v56  ;;  %v3367_v35 = vpop.permute.xlu0 %2003  ;;  %2298 = vrot.lane.b32.xlu1 %v4047_v43, %s2585_s10  ;;  %v2484_v56 = vld [vmem:[%s2669_s30] sm:$0xff] }
  0xd8   : > { %v2005_v52 = vunpack.i.l.bf16 %v3367_v35 }
  0xd9   : > { %2293 = vrot.lane.b32.xlu0 %v2292_v0, %s2584_s9  ;;  %v3372_v63 = vpop.permute.xlu1 %2018 }
  0xdb   : > { %v3374_v37 = vpop.permute.xlu0 %2013  ;;  %2308 = vrot.lane.b32.xlu1 %v3032_v2, %s2586_s11 }
  0xdd   : > { %2303 = vrot.lane.b32.xlu0 %v4048_v60, %s2585_s10  ;;  %v2029_v39 = vpop.permute.xlu1 %2028 }
  0xde   : > { %v2031_v53 = vunpack.i.h.bf16 %v2029_v39  ;;  %v2030_v26 = vunpack.i.l.bf16 %v2029_v39 }
  0xdf   : > { %v2024_v42 = vpop.permute.xlu0 %2023  ;;  %2318 = vrot.lane.b32.xlu1 %v2292_v0, %s2581_s6 }
  0xe0   : > { %v3383_v50 = vsel %vm1323_vm4, %v3252_v48, %v2030_v26  ;;  %v3387_v9 = vsel %vm1323_vm4, %v3249_v16, %v2031_v53  ;;  %v2026_v10 = vunpack.i.h.bf16 %v2024_v42  ;;  %v2025_v33 = vunpack.i.l.bf16 %v2024_v42  ;;  %v248_v53 = vld [vmem:[%s2669_s30 + $0x188] sm:$0xff]  ;;  %v249_v26 = vld [vmem:[%s2669_s30 + $0x190] sm:$0x3] }
  0xe1   : > { %4049 = vst [vmem:[#allocation7_spill] sm:$0xff] %v3383_v50  ;;  %4050 = vst [vmem:[#allocation13_spill] sm:$0xff] %v3387_v9  ;;  %2313 = vrot.lane.b32.xlu0 %v3091_v51, %s2586_s11  ;;  %v2039_v28 = vpop.permute.xlu1 %2038  ;;  %v2486_v9 = vld [vmem:[%s2669_s30 + $0xc0] sm:$0xff] }
  0xe2   : > { %v3393_v8 = vsel %vm1323_vm4, %v3263_v54, %v2025_v33  ;;  %v3397_v20 = vsel %vm1323_vm4, %v3266_v18, %v2026_v10  ;;  %v2041_v48 = vunpack.i.h.bf16 %v2039_v28  ;;  %v2040_v36 = vunpack.i.l.bf16 %v2039_v28  ;;  %v4055_v28 = vld [vmem:[#allocation19_spill] sm:$0xff] }
  0xe3   : > { %v2034_v16 = vpop.permute.xlu0 %2033  ;;  %2328 = vrot.lane.b32.xlu1 %v4048_v60, %s2582_s7  ;;  %v757_v10 = vrot.slane %v249_v26, 1 }
  0xe4   : > { %v3403_v31 = vsel %vm1323_vm4, %v3278_v6, %v2040_v36  ;;  %v3407_v54 = vsel %vm1323_vm4, %v3275_v1, %v2041_v48  ;;  %v2036_v57 = vunpack.i.h.bf16 %v2034_v16  ;;  %v2035_v18 = vunpack.i.l.bf16 %v2034_v16 }
  0xe5   : > { %4051 = vst [vmem:[#allocation5_spill] sm:$0xff] %v3403_v31  ;;  %4052 = vst [vmem:[#allocation6_spill] sm:$0xff] %v3407_v54  ;;  %2323 = vrot.lane.b32.xlu0 %v4047_v43, %s2582_s7  ;;  %v3411_v0 = vpop.permute.xlu1 %2048  ;;  %v3427_v1 = vpack.i.bf16 %v2891_v59, %v2888_v47  ;;  %v247_v43 = vld [vmem:[%s2669_s30 + $0x180] sm:$0xff]  ;;  %v856_v36 = vrot.slane %v248_v53, 2  ;;  %v858_v16 = vrot.slane %v249_v26, 2  ;;  %v1886_v31 = vunpack.i.h.bf16 %v3196_v45 }
  0xe6   : > { %v3415_v39 = vsel %vm1323_vm4, %v3289_v32, %v2035_v18  ;;  %v3419_v60 = vsel %vm1323_vm4, %v3292_v46, %v2036_v57  ;;  %v754_v42 = vrot.slane %v247_v43, 1  ;;  %v755_v46 = vrot.slane %v248_v53, 1 }
  0xe7   : > { %4053 = vst [vmem:[#allocation9_spill] sm:$0xff] %v3415_v39  ;;  %4054 = vst [vmem:[#allocation8_spill] sm:$0xff] %v3419_v60  ;;  %v3421_v6 = vpop.permute.xlu0 %2043  ;;  %2338 = vrot.lane.b32.xlu1 %v3091_v51, %s2583_s8  ;;  %v855_v48 = vrot.slane %v247_v43, 2  ;;  %v1846_v57 = vunpack.i.h.bf16 %v3171_v29  ;;  %v1845_v18 = vunpack.i.l.bf16 %v3171_v29  ;;  %v1926_v26 = vunpack.i.h.bf16 %v3227_v4  ;;  %v2485_v39 = vld [vmem:[%s2669_s30 + $0xc8] sm:$0xff] }
  0xe8   : > { %v756_v59 = vsel %vm301_vm0, %v754_v42, %v755_v46  ;;  %v1885_v42 = vunpack.i.l.bf16 %v3196_v45  ;;  %v1925_v29 = vunpack.i.l.bf16 %v3227_v4  ;;  %v2006_v45 = vunpack.i.h.bf16 %v3367_v35 }
  0xe9   : > { %2333 = vrot.lane.b32.xlu0 %v3032_v2, %s2583_s8  ;;  %v3434_v32 = vpop.permute.xlu1 %2058  ;;  %v758_v2 = vsel %vm301_vm0, %v755_v46, %v757_v10  ;;  %v4056_v46 = vld [vmem:[#allocation10_spill] sm:$0xff]  ;;  %v3474_v4 = vsel %vm478_vm1, %v856_v36, %v858_v16  ;;  %v1258_v12 = vsel %vm1257_vm2, %v2484_v56, %v1845_v18  ;;  %v2046_v35 = vunpack.i.h.bf16 %v3421_v6 }
  0xea   : > { %v3458_v54 = vpack.i.bf16 %v758_v2, %v756_v59  ;;  %v3471_v59 = vsel %vm478_vm1, %v855_v48, %v856_v36  ;;  %v2483_v2 = vld [vmem:[%s2669_s30 + $0x8] sm:$0xff]  ;;  %v2045_v60 = vunpack.i.l.bf16 %v3421_v6  ;;  %v1275_v50 = vsel %vm1257_vm2, %v2485_v39, %v1886_v31 }
  0xeb   : > { %v3436_v33 = vpop.permute.xlu0 %2053  ;;  %2348 = vrot.lane.b32.xlu1 %v3427_v1, %s2584_s9  ;;  %v1274_v48 = vsel %vm1257_vm2, %v2486_v9, %v1885_v42  ;;  %v2061_v38 = vunpack.i.h.bf16 %v3434_v32  ;;  %v2060_v36 = vunpack.i.l.bf16 %v3434_v32  ;;  %v1291_v56 = vsel %vm1290_vm3, %v1258_v12, %v1925_v29 }
  0xec   : > { %v1324_v31 = vsel %vm1323_vm4, %v1291_v56, %v2005_v52 }
  0xed   : > { %2343 = vrot.lane.b32.xlu0 %v3127_v11, %s2584_s9  ;;  %v3442_v47 = vpop.permute.xlu1 %2068  ;;  %v3452_v11 = vpack.i.bf16 %v248_v53, %v247_v43  ;;  %v1966_v43 = vunpack.i.h.bf16 %v3294_v30  ;;  %v1965_v53 = vunpack.i.l.bf16 %v3294_v30  ;;  %v1259_v30 = vsel %vm1257_vm2, %v2483_v2, %v1846_v57 }
  0xee   : > { %v1292_v57 = vsel %vm1290_vm3, %v1259_v30, %v1926_v26  ;;  %v2071_v39 = vunpack.i.h.bf16 %v3442_v47  ;;  %v2070_v32 = vunpack.i.l.bf16 %v3442_v47 }
  0xef   : > { %v3446_v51 = vpop.permute.xlu0 %2063  ;;  %2358 = vrot.lane.b32.xlu1 %v4055_v28, %s2585_s10  ;;  %v1307_v6 = vsel %vm1290_vm3, %v1274_v48, %v1965_v53  ;;  %v1308_v18 = vsel %vm1290_vm3, %v1275_v50, %v1966_v43  ;;  %v1325_v9 = vsel %vm1323_vm4, %v1292_v57, %v2006_v45  ;;  %v1357_v50 = vsel %vm1356_vm5, %v1324_v31, %v2060_v36 }
  0xf0   : > { %v1340_v12 = vsel %vm1323_vm4, %v1307_v6, %v2045_v60  ;;  %v1341_v26 = vsel %vm1323_vm4, %v1308_v18, %v2046_v35  ;;  %v1358_v52 = vsel %vm1356_vm5, %v1325_v9, %v2061_v38  ;;  %v2066_v2 = vunpack.i.h.bf16 %v3446_v51 }
  0xf1   : > { %2353 = vrot.lane.b32.xlu0 %v4056_v46, %s2585_s10  ;;  %v2079_v10 = vpop.permute.xlu1 %2078  ;;  %v1390_v35 = vsel %vm1389_vm6, %v1357_v50, %v2070_v32 }
  0xf2   : > { %v2081_v29 = vunpack.i.h.bf16 %v2079_v10  ;;  %v2080_v53 = vunpack.i.l.bf16 %v2079_v10  ;;  %v1391_v10 = vsel %vm1389_vm6, %v1358_v52, %v2071_v39  ;;  %v1374_v9 = vsel %vm1356_vm5, %v1341_v26, %v2066_v2  ;;  %v3549_v2 = vld [vmem:[%s2669_s30 + $0x1a8] sm:$0x3] }
  0xf3   : > { %v3466_v27 = vpop.permute.xlu0 %2073  ;;  %2368 = vrot.lane.b32.xlu1 %v3087_v58, %s2586_s11 }
  0xf4   : > { %v2076_v48 = vunpack.i.h.bf16 %v3466_v27  ;;  %v2075_v38 = vunpack.i.l.bf16 %v3466_v27 }
  0xf5   : > { %2363 = vrot.lane.b32.xlu0 %v3027_v34, %s2586_s11  ;;  %v2089_v16 = vpop.permute.xlu1 %2088 }
  0xf6   : > { %v2091_v43 = vunpack.i.h.bf16 %v2089_v16  ;;  %v2090_v45 = vunpack.i.l.bf16 %v2089_v16  ;;  %v1424_v16 = vsel %vm1422_vm7, %v1391_v10, %v2081_v29 }
  0xf7   : > { %v2084_v42 = vpop.permute.xlu0 %2083  ;;  %2378 = vrot.lane.b32.xlu1 %v4056_v46, %s2582_s7  ;;  %v2065_v46 = vunpack.i.l.bf16 %v3446_v51 }
  0xf8   : > { %v2086_v51 = vunpack.i.h.bf16 %v2084_v42  ;;  %v2085_v56 = vunpack.i.l.bf16 %v2084_v42  ;;  %v1457_v31 = vsel %vm1455_vm8, %v1424_v16, %v2091_v43  ;;  %v3537_v43 = vld [vmem:[%s2669_s30 + $0x198] sm:$0xff]  ;;  %v1058_v16 = vrot.slane %v3549_v2, 1 }
  0xf9   : > { %2373 = vrot.lane.b32.xlu0 %v3427_v1, %s2581_s6  ;;  %v2099_v47 = vpop.permute.xlu1 %2098  ;;  %v1423_v1 = vsel %vm1422_vm7, %v1390_v35, %v2080_v53  ;;  %v3532_v53 = vpack.i.bf16 %v3474_v4, %v3471_v59  ;;  %v4057_v35 = vld [vmem:[#allocation16_spill] sm:$0xff] }
  0xfa   : > { %v2101_v30 = vunpack.i.h.bf16 %v2099_v47  ;;  %v2100_v60 = vunpack.i.l.bf16 %v2099_v47  ;;  %v1456_v27 = vsel %vm1455_vm8, %v1423_v1, %v2090_v45  ;;  %v3540_v45 = vld [vmem:[%s2669_s30 + $0x1a0] sm:$0xff] }
  0xfb   : > { %v2094_v36 = vpop.permute.xlu0 %2093  ;;  %2388 = vrot.lane.b32.xlu1 %v3027_v34, %s2583_s8  ;;  %v1373_v34 = vsel %vm1356_vm5, %v1340_v12, %v2065_v46  ;;  %v2457_v1 = vpack.i.bf16 %v3540_v45, %v3537_v43 }
  0xfc   : > { %v2096_v57 = vunpack.i.h.bf16 %v2094_v36  ;;  %v2095_v6 = vunpack.i.l.bf16 %v2094_v36  ;;  %v1489_v39 = vsel %vm1488_vm9, %v1456_v27, %v2100_v60  ;;  %v1490_v32 = vsel %vm1488_vm9, %v1457_v31, %v2101_v30 }
  0xfd   : > { %2383 = vrot.lane.b32.xlu0 %v4055_v28, %s2582_s7  ;;  %v3518_v18 = vpop.permute.xlu1 %2108  ;;  %v1406_v42 = vsel %vm1389_vm6, %v1373_v34, %v2075_v38  ;;  %v1407_v28 = vsel %vm1389_vm6, %v1374_v9, %v2076_v48  ;;  %v1521_v4 = vpack.c.bf16 %v1490_v32, %v1489_v39  ;;  %v1055_v48 = vrot.slane %v3537_v43, 1 }
  0xfe   : > { %v1439_v12 = vsel %vm1422_vm7, %v1406_v42, %v2085_v56  ;;  %v1440_v26 = vsel %vm1422_vm7, %v1407_v28, %v2086_v51  ;;  %v1851_v38 = vunpack.i.h.bf16 %v3178_v13  ;;  %v1850_v36 = vunpack.i.l.bf16 %v3178_v13  ;;  %v2487_v28 = vld [vmem:[%s2669_s30 + $0x20] sm:$0xff] }
  0xff   : > { %v2104_v29 = vpop.permute.xlu0 %2103  ;;  %2398 = vrot.lane.b32.xlu1 %v3121_v17, %s2584_s9  ;;  %v1472_v17 = vsel %vm1455_vm8, %v1439_v12, %v2095_v6  ;;  %v1473_v59 = vsel %vm1455_vm8, %v1440_v26, %v2096_v57  ;;  %v1891_v51 = vunpack.i.h.bf16 %v3194_v62  ;;  %v1890_v56 = vunpack.i.l.bf16 %v3194_v62 }
 0x100   : > { %v2106_v50 = vunpack.i.h.bf16 %v2104_v29  ;;  %v2105_v52 = vunpack.i.l.bf16 %v2104_v29  ;;  %v1549_v57 = vsel %vm1544_vm10, %v1521_v4, 0  ;;  %v1157_v13 = vrot.slane %v3540_v45, 2  ;;  %v2488_v29 = vld [vmem:[%s2669_s30 + $0x18] sm:$0xff] }
 0x101   : > { %2393 = vrot.lane.b32.xlu0 %v3087_v58, %s2583_s8  ;;  %v3544_v47 = vpop.permute.xlu1 %2118  ;;  %v1056_v58 = vrot.slane %v3540_v45, 1  ;;  %v1931_v27 = vunpack.i.h.bf16 %v3225_v19  ;;  %v1930_v31 = vunpack.i.l.bf16 %v3225_v19  ;;  %v1971_v34 = vunpack.i.h.bf16 %v3286_v5 }
 0x102   : > { %v1505_v46 = vsel %vm1488_vm9, %v1472_v17, %v2105_v52  ;;  %v1506_v30 = vsel %vm1488_vm9, %v1473_v59, %v2106_v50  ;;  %v1970_v62 = vunpack.i.l.bf16 %v3286_v5  ;;  %v2011_v9 = vunpack.i.h.bf16 %v3357_v23  ;;  %v3594_v50 = vld [vmem:[%s2669_s30 + $0xe0] sm:$0xff]  ;;  %v3599_v17 = vld [vmem:[%s2669_s30 + $0xd8] sm:$0xff] }
 0x103   : > { %v3553_v60 = vpop.permute.xlu0 %2113  ;;  %2408 = vrot.lane.b32.xlu1 %v4057_v35, %s2585_s10  ;;  %v1529_v10 = vpack.c.bf16 %v1506_v30, %v1505_v46  ;;  %v2010_v39 = vunpack.i.l.bf16 %v3357_v23  ;;  %v1156_v42 = vrot.slane %v3537_v43, 2  ;;  %v3585_v19 = vsel %vm301_vm0, %v1055_v48, %v1056_v58 }
 0x104   : > { %v1261_v5 = vsel %vm1257_vm2, %v2487_v28, %v1851_v38  ;;  %v1260_v12 = vsel %vm1257_vm2, %v2488_v29, %v1850_v36  ;;  %v2051_v23 = vunpack.i.h.bf16 %v3411_v0  ;;  %v2050_v26 = vunpack.i.l.bf16 %v3411_v0 }
 0x105   : > { %2403 = vrot.lane.b32.xlu0 %v3452_v11, %s2584_s9  ;;  %1769 = vmatprep.subr.msk.bf16.mxu0 %vm1544_vm10, %v1529_v10  ;;  %v2129_v6 = vpop.permute.xlu1 %2128  ;;  %v1277_v52 = vsel %vm1257_vm2, %v3594_v50, %v1891_v51  ;;  %v1276_v59 = vsel %vm1257_vm2, %v3599_v17, %v1890_v56  ;;  %v2111_v4 = vunpack.i.h.bf16 %v3518_v18  ;;  %v2110_v46 = vunpack.i.l.bf16 %v3518_v18 }
 0x106   : > { %1752 = vmatpush3.bf16.xpose.msra.mxu0 %v1549_v57  ;;  %v1293_v0 = vsel %vm1290_vm3, %v1260_v12, %v1930_v31  ;;  %v1294_v10 = vsel %vm1290_vm3, %v1261_v5, %v1931_v27  ;;  %v1310_v48 = vsel %vm1290_vm3, %v1277_v52, %v1971_v34  ;;  %v1309_v38 = vsel %vm1290_vm3, %v1276_v59, %v1970_v62 }
 0x107   : > { %v3577_v32 = vpop.permute.xlu0 %2123  ;;  %2418 = vrot.lane.b32.xlu1 %v3053_v15, %s2586_s11  ;;  %v1326_v36 = vsel %vm1323_vm4, %v1293_v0, %v2010_v39  ;;  %v1327_v51 = vsel %vm1323_vm4, %v1294_v10, %v2011_v9  ;;  %v2121_v56 = vunpack.i.h.bf16 %v3544_v47  ;;  %v2120_v18 = vunpack.i.l.bf16 %v3544_v47 }
 0x108   : > { %v1342_v31 = vsel %vm1323_vm4, %v1309_v38, %v2050_v26  ;;  %v1343_v27 = vsel %vm1323_vm4, %v1310_v48, %v2051_v23  ;;  %v2131_v28 = vunpack.i.h.bf16 %v2129_v6  ;;  %v2130_v34 = vunpack.i.l.bf16 %v2129_v6 }
 0x109   : > { %2413 = vrot.lane.b32.xlu0 %v3458_v54, %s2585_s10  ;;  %v2139_v30 = vpop.permute.xlu1 %2138  ;;  %v1359_v62 = vsel %vm1356_vm5, %v1326_v36, %v2110_v46  ;;  %v1360_v39 = vsel %vm1356_vm5, %v1327_v51, %v2111_v4  ;;  %v2116_v29 = vunpack.i.h.bf16 %v3553_v60  ;;  %v2126_v52 = vunpack.i.h.bf16 %v3577_v32 }
 0x10a   : > { %v2141_v5 = vunpack.i.h.bf16 %v2139_v30  ;;  %v2140_v9 = vunpack.i.l.bf16 %v2139_v30  ;;  %v1392_v23 = vsel %vm1389_vm6, %v1359_v62, %v2120_v18  ;;  %v1393_v6 = vsel %vm1389_vm6, %v1360_v39, %v2121_v56 }
 0x10b   : > { %v2134_v57 = vpop.permute.xlu0 %2133  ;;  %2428 = vrot.lane.b32.xlu1 %v3452_v11, %s2581_s6  ;;  %v2115_v11 = vunpack.i.l.bf16 %v3553_v60  ;;  %v2125_v59 = vunpack.i.l.bf16 %v3577_v32  ;;  %v1425_v46 = vsel %vm1422_vm7, %v1392_v23, %v2130_v34  ;;  %v1426_v30 = vsel %vm1422_vm7, %v1393_v6, %v2131_v28  ;;  %s3930_s6 = scalar_lea.hbm %s3980_s3, %s1750_s28 }
 0x10c   : > { %v2136_v0 = vunpack.i.h.bf16 %v2134_v57  ;;  %v2135_v60 = vunpack.i.l.bf16 %v2134_v57  ;;  %v1458_v10 = vsel %vm1455_vm8, %v1425_v46, %v2140_v9  ;;  %v1459_v48 = vsel %vm1455_vm8, %v1426_v30, %v2141_v5 }
 0x10d   : > { %2423 = vrot.lane.b32.xlu0 %v3532_v53, %s2586_s11  ;;  %v2149_v47 = vpop.permute.xlu1 %2148  ;;  %v1376_v51 = vsel %vm1356_vm5, %v1343_v27, %v2116_v29  ;;  %v1855_v23 = vunpack.i.l.bf16 %v3169_v61  ;;  %v1896_v6 = vunpack.i.h.bf16 %v3205_v7  ;;  %v1976_v45 = vunpack.i.h.bf16 %v3304_v24 }
 0x10e   : > { %v2151_v12 = vunpack.i.h.bf16 %v2149_v47  ;;  %v2150_v26 = vunpack.i.l.bf16 %v2149_v47  ;;  %v1409_v28 = vsel %vm1389_vm6, %v1376_v51, %v2126_v52  ;;  %v1895_v52 = vunpack.i.l.bf16 %v3205_v7  ;;  %v3695_v7 = vld [vmem:[%s3978_s1] sm:$0xf] }
 0x10f   : > { %v2144_v4 = vpop.permute.xlu0 %2143  ;;  %2438 = vrot.lane.b32.xlu1 %v3458_v54, %s2582_s7  ;;  %v1375_v54 = vsel %vm1356_vm5, %v1342_v31, %v2115_v11  ;;  %v1159_v31 = vrot.slane %v3549_v2, 2  ;;  %v1442_v62 = vsel %vm1422_vm7, %v1409_v28, %v2136_v0  ;;  %v1856_v11 = vunpack.i.h.bf16 %v3169_v61  ;;  %1767 = vmatprep.mubr.msk.bf16.mxu0 %vm1544_vm10, %v3695_v7  ;;  %v2492_v0 = vld [vmem:[%s2669_s30 + $0x30] sm:$0xff] }
 0x110   : > { %v2146_v38 = vunpack.i.h.bf16 %v2144_v4  ;;  %v2145_v36 = vunpack.i.l.bf16 %v2144_v4  ;;  %v1491_v56 = vsel %vm1488_vm9, %v1458_v10, %v2150_v26  ;;  %v1492_v18 = vsel %vm1488_vm9, %v1459_v48, %v2151_v12 }
 0x111   : > { %2433 = vrot.lane.b32.xlu0 %v4057_v35, %s2582_s7  ;;  %v3637_v32 = vpop.permute.xlu1 %2158  ;;  %v1408_v57 = vsel %vm1389_vm6, %v1375_v54, %v2125_v59  ;;  %v1059_v35 = vsel %vm301_vm0, %v1056_v58, %v1058_v16  ;;  %v2452_v58 = vpack.i.bf16 %v3594_v50, %v3599_v17  ;;  %v1522_v16 = vpack.c.bf16 %v1492_v18, %v1491_v56  ;;  %v2491_v59 = vld [vmem:[%s2669_s30 + $0x38] sm:$0xff] }
 0x112   : > { %v1441_v27 = vsel %vm1422_vm7, %v1408_v57, %v2135_v60  ;;  %v1475_v47 = vsel %vm1455_vm8, %v1442_v62, %v2146_v38  ;;  %v1158_v50 = vsel %vm478_vm1, %v1156_v42, %v1157_v13  ;;  %v1160_v17 = vsel %vm478_vm1, %v1157_v13, %v1159_v31  ;;  %v2493_v38 = vld [vmem:[%s2669_s30 + $0xf8] sm:$0xff] }
 0x113   : > { %v2154_v34 = vpop.permute.xlu0 %2153  ;;  %2448 = vrot.lane.b32.xlu1 %v3532_v53, %s2583_s8  ;;  %v1474_v9 = vsel %vm1455_vm8, %v1441_v27, %v2145_v36  ;;  %v1552_v61 = vsel %vm1544_vm10, %v1522_v16, 0  ;;  %v1936_v42 = vunpack.i.h.bf16 %v3235_v3  ;;  %v1975_v13 = vunpack.i.l.bf16 %v3304_v24  ;;  %v2494_v36 = vld [vmem:[%s2669_s30 + $0xf0] sm:$0xff] }
 0x114   : > { %v2156_v39 = vunpack.i.h.bf16 %v2154_v34  ;;  %v2155_v5 = vunpack.i.l.bf16 %v2154_v34  ;;  %v1263_v4 = vsel %vm1257_vm2, %v2491_v59, %v1856_v11  ;;  %v2016_v46 = vunpack.i.h.bf16 %v3374_v37 }
 0x115   : > { %2443 = vrot.lane.b32.xlu0 %v3053_v15, %s2583_s8  ;;  %v3659_v53 = vpop.permute.xlu1 %2168  ;;  %v2467_v15 = vpack.i.bf16 %v1059_v35, %v3585_v19  ;;  %v2015_v19 = vunpack.i.l.bf16 %v3374_v37  ;;  %v2477_v24 = vpack.i.bf16 %v1160_v17, %v1158_v50  ;;  %v1262_v60 = vsel %vm1257_vm2, %v2492_v0, %v1855_v23  ;;  %v1538_v23 = vld [vmem:[%s3979_s2] sm:$0xff]  ;;  %s2588_s8 = smov [#allocation2]  }
 0x116   : > { %v1507_v2 = vsel %vm1488_vm9, %v1474_v9, %v2155_v5  ;;  %v1508_v29 = vsel %vm1488_vm9, %v1475_v47, %v2156_v39  ;;  %v2056_v10 = vunpack.i.h.bf16 %v3436_v33  ;;  %v2160_v48 = vunpack.i.l.bf16 %v3637_v32 }
 0x117   : > { %v1530_v12 = vpack.c.bf16 %v1508_v29, %v1507_v2  ;;  %v3666_v26 = vpop.permute.xlu0 %2163  ;;  %2458 = vrot.lane.b32.xlu1 %v2457_v1, %s2584_s9  ;;  %v1935_v1 = vunpack.i.l.bf16 %v3235_v3  ;;  %v2055_v3 = vunpack.i.l.bf16 %v3436_v33  ;;  %v1279_v37 = vsel %vm1257_vm2, %v2493_v38, %v1896_v6 }
 0x118   : > { %v1278_v51 = vsel %vm1257_vm2, %v2494_v36, %v1895_v52  ;;  %v2161_v56 = vunpack.i.h.bf16 %v3637_v32  ;;  %v1296_v57 = vsel %vm1290_vm3, %v1263_v4, %v1936_v42  ;;  %v1312_v28 = vsel %vm1290_vm3, %v1279_v37, %v1976_v45 }
 0x119   : > { %2453 = vrot.lane.b32.xlu0 %v2452_v58, %s2584_s9  ;;  %1770 = vmatprep.subr.msk.bf16.mxu0 %vm1544_vm10, %v1530_v12  ;;  %v2179_v43 = vpop.permute.xlu1 %2178  ;;  %v1295_v54 = vsel %vm1290_vm3, %v1262_v60, %v1935_v1  ;;  %v1311_v33 = vsel %vm1290_vm3, %v1278_v51, %v1975_v13  ;;  %v1329_v35 = vsel %vm1323_vm4, %v1296_v57, %v2016_v46  ;;  %v2171_v27 = vunpack.i.h.bf16 %v3659_v53  ;;  %s2503_s9 = sshll.u32 %s2588_s8, 4  ;;  %s2504_s9 = int_to_ptr.vmem [resolvable:$false] %s2503_s9 }
 0x11a   : > { %1754 = vmatpush3.bf16.xpose.msra.mxu0 %v1552_v61  ;;  %v1328_v34 = vsel %vm1323_vm4, %v1295_v54, %v2015_v19  ;;  %v1344_v31 = vsel %vm1323_vm4, %v1311_v33, %v2055_v3  ;;  %v2170_v32 = vunpack.i.l.bf16 %v3659_v53  ;;  %v2181_v5 = vunpack.i.h.bf16 %v2179_v43 }
 0x11b   : > { %v3701_v30 = vpop.permute.xlu0 %2173  ;;  %2468 = vrot.lane.b32.xlu1 %v2467_v15, %s2585_s10  ;;  %v1361_v39 = vsel %vm1356_vm5, %v1328_v34, %v2160_v48  ;;  %v2180_v9 = vunpack.i.l.bf16 %v2179_v43  ;;  %v1362_v47 = vsel %vm1356_vm5, %v1329_v35, %v2161_v56  ;;  %v2166_v29 = vunpack.i.h.bf16 %v3666_v26 }
 0x11c   : > { %v2165_v53 = vunpack.i.l.bf16 %v3666_v26  ;;  %v2587_v15 = vmov 0   ;;  %v1394_v50 = vsel %vm1389_vm6, %v1361_v39, %v2170_v32  ;;  %v1395_v17 = vsel %vm1389_vm6, %v1362_v47, %v2171_v27 }
 0x11d   : > { %2463 = vrot.lane.b32.xlu0 %v4036_v40, %s2585_s10  ;;  %v2189_v18 = vpop.permute.xlu1 %2188  ;;  %v1345_v40 = vsel %vm1323_vm4, %v1312_v28, %v2056_v10  ;;  %v2176_v6 = vunpack.i.h.bf16 %v3701_v30  ;;  %v1427_v1 = vsel %vm1422_vm7, %v1394_v50, %v2180_v9  ;;  %v1428_v26 = vsel %vm1422_vm7, %v1395_v17, %v2181_v5  ;;  %s2505_s10 = scalar_lea.vmem %s2504_s9, 512 }
 0x11e   : > { %v2191_v58 = vunpack.i.h.bf16 %v2189_v18  ;;  %v2190_v16 = vunpack.i.l.bf16 %v2189_v18  ;;  %2482 = vset.pattern.permute.xlu0 %v2587_v15  ;;  %v1377_v4 = vsel %vm1356_vm5, %v1344_v31, %v2165_v53  ;;  %v1378_v46 = vsel %vm1356_vm5, %v1345_v40, %v2166_v29  ;;  %v2497_v53 = vld [vmem:[%s2669_s30 + $0x110] sm:$0xff] }
 0x11f   : > { %v2184_v62 = vpop.permute.xlu0 %2183  ;;  %2478 = vrot.lane.b32.xlu1 %v2477_v24, %s2586_s11  ;;  %v1411_v0 = vsel %vm1389_vm6, %v1378_v46, %v2176_v6  ;;  %v1861_v34 = vunpack.i.h.bf16 %v3176_v41  ;;  %v1860_v35 = vunpack.i.l.bf16 %v3176_v41  ;;  %v1901_v31 = vunpack.i.h.bf16 %v3201_v21 }
 0x120   : > { %v2186_v61 = vunpack.i.h.bf16 %v2184_v62  ;;  %v2185_v43 = vunpack.i.l.bf16 %v2184_v62  ;;  %v1460_v42 = vsel %vm1455_vm8, %v1427_v1, %v2190_v16  ;;  %v1461_v45 = vsel %vm1455_vm8, %v1428_v26, %v2191_v58  ;;  %v2495_v58 = vld [vmem:[%s2669_s30 + $0x50] sm:$0xff] }
 0x121   : > { %2473 = vrot.lane.b32.xlu0 %v3048_v14, %s2586_s11  ;;  %v2199_v2 = vpop.permute.xlu1 %2198  ;;  %v2175_v14 = vunpack.i.l.bf16 %v3701_v30  ;;  %v1900_v27 = vunpack.i.l.bf16 %v3201_v21  ;;  %v1941_v40 = vunpack.i.h.bf16 %v3233_v55  ;;  %v1940_v39 = vunpack.i.l.bf16 %v3233_v55  ;;  %v2498_v55 = vld [vmem:[%s2669_s30 + $0x108] sm:$0xff] }
 0x122   : > { %v2201_v11 = vunpack.i.h.bf16 %v2199_v2  ;;  %v2200_v12 = vunpack.i.l.bf16 %v2199_v2  ;;  %v1444_v48 = vsel %vm1422_vm7, %v1411_v0, %v2186_v61  ;;  %v1981_v5 = vunpack.i.h.bf16 %v3300_v49  ;;  %v2496_v2 = vld [vmem:[%s2669_s30 + $0x48] sm:$0xff]  ;;  %s1658_s30 = sshll.u32 %s187_s29, 4  ;;  %s3932_s30 = int_to_ptr.vmem [resolvable:$true] %s1658_s30 }
 0x123   : > { %v2194_v52 = vpop.permute.xlu0 %2193  ;;  %v1410_v24 = vsel %vm1389_vm6, %v1377_v4, %v2175_v14  ;;  %v1980_v41 = vunpack.i.l.bf16 %v3300_v49  ;;  %v2021_v9 = vunpack.i.h.bf16 %v3372_v63  ;;  %v2020_v21 = vunpack.i.l.bf16 %v3372_v63  ;;  %s2499_s7 = scalar_lea.vmem %s3932_s30, 256  ;;  %p2506_p1 = scmp.lt.s32.totalorder %s3932_s30, %s2504_s9 }
 0x124   : > { %v2196_v13 = vunpack.i.h.bf16 %v2194_v52  ;;  %v2195_v19 = vunpack.i.l.bf16 %v2194_v52  ;;  %v1493_v3 = vsel %vm1488_vm9, %v1460_v42, %v2200_v12  ;;  %v1494_v30 = vsel %vm1488_vm9, %v1461_v45, %v2201_v11  ;;  %p2500_p12 = scmp.ne.s32.totalorder %s3932_s30, %s2499_s7  ;;  %p2507_p2 = scmp.lt.s32.totalorder %s2505_s10, %s2499_s7 }
 0x125   : > { %v3745_v59 = vpop.permute.xlu1 %2208  ;;  %1541 = vperm.xlu0 %2482, %v1538_v23   ;;  %v1443_v10 = vsel %vm1422_vm7, %v1410_v24, %v2185_v43  ;;  %v1523_v56 = vpack.c.bf16 %v1494_v30, %v1493_v3  ;;  %v1265_v16 = vsel %vm1257_vm2, %v2495_v58, %v1861_v34  ;;  %v1264_v29 = vsel %vm1257_vm2, %v2496_v2, %v1860_v35 }
 0x126   : > { %v1476_v36 = vsel %vm1455_vm8, %v1443_v10, %v2195_v19  ;;  %v1477_v51 = vsel %vm1455_vm8, %v1444_v48, %v2196_v13  ;;  %v1281_v11 = vsel %vm1257_vm2, %v2497_v53, %v1901_v31  ;;  %v1280_v12 = vsel %vm1257_vm2, %v2498_v55, %v1900_v27  ;;  %p2501_p13 = pnand %p2500_p12, %p2649_p4  ;;  %p2508_p3 = por %p2507_p2, %p2506_p1 }
 0x127   : > { %v2204_v60 = vpop.permute.xlu0 %2203  ;;  %v1555_v32 = vsel %vm1544_vm10, %v1523_v56, 0  ;;  %v2211_v15 = vunpack.i.h.bf16 %v3745_v59  ;;  %v2210_v49 = vunpack.i.l.bf16 %v3745_v59  ;;  %v1298_v63 = vsel %vm1290_vm3, %v1265_v16, %v1941_v40 }
 0x128   : > { %v2206_v38 = vunpack.i.h.bf16 %v2204_v60  ;;  %v2205_v37 = vunpack.i.l.bf16 %v2204_v60  ;;  %v1297_v50 = vsel %vm1290_vm3, %v1264_v29, %v1940_v39  ;;  %v1314_v14 = vsel %vm1290_vm3, %v1281_v11, %v1981_v5  ;;  %p2502_p0 = pneg %p2501_p13 }
 0x129   : > { %v2219_v54 = vpop.permute.xlu1 %2218  ;;  %v1313_v52 = vsel %vm1290_vm3, %v1280_v12, %v1980_v41  ;;  %v1330_v1 = vsel %vm1323_vm4, %v1297_v50, %v2020_v21  ;;  %v1331_v26 = vsel %vm1323_vm4, %v1298_v63, %v2021_v9  ;;  %v1347_v19 = vsel %vm1323_vm4, %v1314_v14, %v2211_v15 }
 0x12a   : > { %v1509_v18 = vsel %vm1488_vm9, %v1476_v36, %v2205_v37  ;;  %v1510_v57 = vsel %vm1488_vm9, %v1477_v51, %v2206_v38  ;;  %v2221_v17 = vunpack.i.h.bf16 %v2219_v54  ;;  %v2220_v6 = vunpack.i.l.bf16 %v2219_v54  ;;  %p2509_p5 = pnand %p2508_p3, %p2502_p0 }
 0x12b   : > { %v1531_v33 = vpack.c.bf16 %v1510_v57, %v1509_v18  ;;  %v2214_v28 = vpop.permute.xlu0 %2213  ;;  %v1346_v59 = vsel %vm1323_vm4, %v1313_v52, %v2210_v49 }
 0x12c   : > { %v2216_v43 = vunpack.i.h.bf16 %v2214_v28  ;;  %v2215_v42 = vunpack.i.l.bf16 %v2214_v28  ;;  %v1379_v30 = vsel %vm1356_vm5, %v1346_v59, %v2220_v6  ;;  %v1380_v24 = vsel %vm1356_vm5, %v1347_v19, %v2221_v17 }
 0x12d   : > { %1771 = vmatprep.subr.msk.bf16.mxu0 %vm1544_vm10, %v1531_v33  ;;  %v2229_v62 = vpop.permute.xlu1 %2228 }
 0x12e   : > { %1756 = vmatpush3.bf16.xpose.msra.mxu0 %v1555_v32  ;;  %v2231_v45 = vunpack.i.h.bf16 %v2229_v62  ;;  %v2230_v13 = vunpack.i.l.bf16 %v2229_v62  ;;  %v1364_v51 = vsel %vm1356_vm5, %v1331_v26, %v2216_v43  ;;  %v1363_v54 = vsel %vm1356_vm5, %v1330_v1, %v2215_v42 }
 0x12f   : > { %v2224_v47 = vpop.permute.xlu0 %2223 }
 0x130   : > { %v2226_v4 = vunpack.i.h.bf16 %v2224_v47  ;;  %v2225_v46 = vunpack.i.l.bf16 %v2224_v47  ;;  %v1412_v56 = vsel %vm1389_vm6, %v1379_v30, %v2230_v13  ;;  %v1413_v18 = vsel %vm1389_vm6, %v1380_v24, %v2231_v45 }
 0x131   : > { %v2239_v23 = vpop.permute.xlu1 %2238 }
 0x132   : > { %v2241_v0 = vunpack.i.h.bf16 %v2239_v23  ;;  %v2240_v60 = vunpack.i.l.bf16 %v2239_v23  ;;  %v1396_v57 = vsel %vm1389_vm6, %v1363_v54, %v2225_v46  ;;  %v1397_v33 = vsel %vm1389_vm6, %v1364_v51, %v2226_v4 }
 0x133   : > { %v2234_v61 = vpop.permute.xlu0 %2233 }
 0x134   : > { %v2236_v10 = vunpack.i.h.bf16 %v2234_v61  ;;  %v2235_v48 = vunpack.i.l.bf16 %v2234_v61  ;;  %v1445_v31 = vsel %vm1422_vm7, %v1412_v56, %v2240_v60  ;;  %v1446_v27 = vsel %vm1422_vm7, %v1413_v18, %v2241_v0 }
 0x135   : > { %v2249_v3 = vpop.permute.xlu1 %2248 }
 0x136   : > { %v2251_v38 = vunpack.i.h.bf16 %v2249_v3  ;;  %v2250_v37 = vunpack.i.l.bf16 %v2249_v3  ;;  %v1429_v40 = vsel %vm1422_vm7, %v1396_v57, %v2235_v48  ;;  %v1430_v39 = vsel %vm1422_vm7, %v1397_v33, %v2236_v10 }
 0x137   : > { %v2244_v36 = vpop.permute.xlu0 %2243 }
 0x138   : > { %v2246_v28 = vunpack.i.h.bf16 %v2244_v36  ;;  %v2245_v34 = vunpack.i.l.bf16 %v2244_v36  ;;  %v1478_v5 = vsel %vm1455_vm8, %v1445_v31, %v2250_v37  ;;  %v1479_v41 = vsel %vm1455_vm8, %v1446_v27, %v2251_v38 }
 0x139   : > { %v2259_v35 = vpop.permute.xlu1 %2258 }
 0x13a   : > { %v2261_v32 = vunpack.i.h.bf16 %v2259_v35  ;;  %v2260_v62 = vunpack.i.l.bf16 %v2259_v35  ;;  %v1462_v2 = vsel %vm1455_vm8, %v1429_v40, %v2245_v34  ;;  %v1463_v29 = vsel %vm1455_vm8, %v1430_v39, %v2246_v28 }
 0x13b   : > { %v2254_v9 = vpop.permute.xlu0 %2253 }
 0x13c   : > { %v1511_v21 = vsel %vm1488_vm9, %v1478_v5, %v2260_v62  ;;  %v1512_v47 = vsel %vm1488_vm9, %v1479_v41, %v2261_v32  ;;  %v2256_v58 = vunpack.i.h.bf16 %v2254_v9  ;;  %v2255_v16 = vunpack.i.l.bf16 %v2254_v9 }
 0x13d   : > { %v1532_v53 = vpack.c.bf16 %v1512_v47, %v1511_v21  ;;  %v2269_v11 = vpop.permute.xlu1 %2268 }
 0x13e   : > { %v1495_v55 = vsel %vm1488_vm9, %v1462_v2, %v2255_v16  ;;  %v1496_v12 = vsel %vm1488_vm9, %v1463_v29, %v2256_v58  ;;  %v2271_v14 = vunpack.i.h.bf16 %v2269_v11  ;;  %v2270_v52 = vunpack.i.l.bf16 %v2269_v11 }
 0x13f   : > { %v2264_v15 = vpop.permute.xlu0 %2263  ;;  %1772 = vmatprep.subr.msk.bf16.mxu0 %vm1544_vm10, %v1532_v53  ;;  %v1524_v49 = vpack.c.bf16 %v1496_v12, %v1495_v55 }
 0x140   : > { %v2265_v1 = vunpack.i.l.bf16 %v2264_v15  ;;  %v1365_v4 = vsel %vm1356_vm5, %v3393_v8, %v2270_v52  ;;  %v1366_v46 = vsel %vm1356_vm5, %v3397_v20, %v2271_v14  ;;  %v2266_v3 = vunpack.i.h.bf16 %v2264_v15 }
 0x141   : > { %v1558_v23 = vsel %vm1544_vm10, %v1524_v49, 0  ;;  %v2279_v63 = vpop.permute.xlu1 %2278 }
 0x142   : > { %1758 = vmatpush3.bf16.xpose.msra.mxu0 %v1558_v23  ;;  %v2281_v26 = vunpack.i.h.bf16 %v2279_v63  ;;  %v2280_v61 = vunpack.i.l.bf16 %v2279_v63  ;;  %v1348_v30 = vsel %vm1323_vm4, %v3334_v22, %v2265_v1  ;;  %v1349_v34 = vsel %vm1323_vm4, %v3337_v25, %v2266_v3 }
 0x143   : > { %v2274_v50 = vpop.permute.xlu0 %2273 }
 0x144   : > { %v1398_v24 = vsel %vm1389_vm6, %v1365_v4, %v2280_v61  ;;  %v1399_v0 = vsel %vm1389_vm6, %v1366_v46, %v2281_v26  ;;  %v2276_v60 = vunpack.i.h.bf16 %v2274_v50  ;;  %v2275_v10 = vunpack.i.l.bf16 %v2274_v50 }
 0x145   : > { %v2289_v17 = vpop.permute.xlu1 %2288 }
 0x146   : > { %v2291_v42 = vunpack.i.h.bf16 %v2289_v17  ;;  %v2290_v45 = vunpack.i.l.bf16 %v2289_v17  ;;  %v1381_v62 = vsel %vm1356_vm5, %v1348_v30, %v2275_v10  ;;  %v1382_v40 = vsel %vm1356_vm5, %v1349_v34, %v2276_v60 }
 0x147   : > { %v2284_v6 = vpop.permute.xlu0 %2283 }
 0x148   : > { %v1431_v38 = vsel %vm1422_vm7, %v1398_v24, %v2290_v45  ;;  %v1432_v37 = vsel %vm1422_vm7, %v1399_v0, %v2291_v42  ;;  %v2286_v51 = vunpack.i.h.bf16 %v2284_v6  ;;  %v2285_v54 = vunpack.i.l.bf16 %v2284_v6  ;;  %v4058_v42 = vld [vmem:[#allocation12_spill] sm:$0xff] }
 0x149   : > { %v2299_v43 = vpop.permute.xlu1 %2298 }
 0x14a   : > { %v2301_v13 = vunpack.i.h.bf16 %v2299_v43  ;;  %v2300_v19 = vunpack.i.l.bf16 %v2299_v43  ;;  %v1414_v39 = vsel %vm1389_vm6, %v1381_v62, %v2285_v54  ;;  %v1415_v5 = vsel %vm1389_vm6, %v1382_v40, %v2286_v51 }
 0x14b   : > { %v2294_v59 = vpop.permute.xlu0 %2293 }
 0x14c   : > { %v1464_v20 = vsel %vm1455_vm8, %v1431_v38, %v2300_v19  ;;  %v1465_v56 = vsel %vm1455_vm8, %v1432_v37, %v2301_v13  ;;  %v2296_v18 = vunpack.i.h.bf16 %v2294_v59  ;;  %v2295_v57 = vunpack.i.l.bf16 %v2294_v59  ;;  %v4059_v38 = vld [vmem:[#allocation13_spill] sm:$0xff]  ;;  %v4060_v37 = vld [vmem:[#allocation7_spill] sm:$0xff] }
 0x14d   : > { %v2309_v48 = vpop.permute.xlu1 %2308 }
 0x14e   : > { %v2311_v36 = vunpack.i.h.bf16 %v2309_v48  ;;  %v2310_v8 = vunpack.i.l.bf16 %v2309_v48  ;;  %v1447_v9 = vsel %vm1422_vm7, %v1414_v39, %v2295_v57  ;;  %v1448_v21 = vsel %vm1422_vm7, %v1415_v5, %v2296_v18 }
 0x14f   : > { %v2304_v22 = vpop.permute.xlu0 %2303 }
 0x150   : > { %v1497_v33 = vsel %vm1488_vm9, %v1464_v20, %v2310_v8  ;;  %v1498_v28 = vsel %vm1488_vm9, %v1465_v56, %v2311_v36  ;;  %v2306_v35 = vunpack.i.h.bf16 %v2304_v22  ;;  %v2305_v31 = vunpack.i.l.bf16 %v2304_v22 }
 0x151   : > { %v2319_v27 = vpop.permute.xlu1 %2318  ;;  %v1525_v32 = vpack.c.bf16 %v1498_v28, %v1497_v33 }
 0x152   : > { %v1480_v25 = vsel %vm1455_vm8, %v1447_v9, %v2305_v31  ;;  %v1481_v16 = vsel %vm1455_vm8, %v1448_v21, %v2306_v35  ;;  %v2321_v23 = vunpack.i.h.bf16 %v2319_v27  ;;  %v2320_v63 = vunpack.i.l.bf16 %v2319_v27 }
 0x153   : > { %v2314_v41 = vpop.permute.xlu0 %2313  ;;  %v1561_v12 = vsel %vm1544_vm10, %v1525_v32, 0 }
 0x154   : > { %v2316_v47 = vunpack.i.h.bf16 %v2314_v41  ;;  %v2315_v58 = vunpack.i.l.bf16 %v2314_v41  ;;  %v1351_v43 = vsel %vm1323_vm4, %v3320_v44, %v2321_v23  ;;  %v1350_v45 = vsel %vm1323_vm4, %v4058_v42, %v2320_v63 }
 0x155   : > { %v2329_v2 = vpop.permute.xlu1 %2328 }
 0x156   : > { %v1513_v29 = vsel %vm1488_vm9, %v1480_v25, %v2315_v58  ;;  %v1514_v53 = vsel %vm1488_vm9, %v1481_v16, %v2316_v47  ;;  %v2331_v17 = vunpack.i.h.bf16 %v2329_v2  ;;  %v2330_v6 = vunpack.i.l.bf16 %v2329_v2 }
 0x157   : > { %v1533_v11 = vpack.c.bf16 %v1514_v53, %v1513_v29  ;;  %v2324_v55 = vpop.permute.xlu0 %2323 }
 0x158   : > { %v2326_v52 = vunpack.i.h.bf16 %v2324_v55  ;;  %v2325_v1 = vunpack.i.l.bf16 %v2324_v55  ;;  %v1383_v4 = vsel %vm1356_vm5, %v1350_v45, %v2330_v6  ;;  %v1384_v46 = vsel %vm1356_vm5, %v1351_v43, %v2331_v17  ;;  %v4061_v43 = vld [vmem:[#allocation9_spill] sm:$0xff]  ;;  %v4062_v45 = vld [vmem:[#allocation8_spill] sm:$0xff] }
 0x159   : > { %1773 = vmatprep.subr.msk.bf16.mxu0 %vm1544_vm10, %v1533_v11  ;;  %v2339_v15 = vpop.permute.xlu1 %2338 }
 0x15a   : > { %1760 = vmatpush3.bf16.xpose.msra.mxu0 %v1561_v12  ;;  %v2341_v26 = vunpack.i.h.bf16 %v2339_v15  ;;  %v2340_v61 = vunpack.i.l.bf16 %v2339_v15  ;;  %v1368_v44 = vsel %vm1356_vm5, %v4059_v38, %v2326_v52  ;;  %v1367_v36 = vsel %vm1356_vm5, %v4060_v37, %v2325_v1 }
 0x15b   : > { %v2334_v49 = vpop.permute.xlu0 %2333 }
 0x15c   : > { %v2336_v13 = vunpack.i.h.bf16 %v2334_v49  ;;  %v2335_v19 = vunpack.i.l.bf16 %v2334_v49  ;;  %v1416_v8 = vsel %vm1389_vm6, %v1383_v4, %v2340_v61  ;;  %v1417_v51 = vsel %vm1389_vm6, %v1384_v46, %v2341_v26 }
 0x15d   : > { %v2349_v50 = vpop.permute.xlu1 %2348 }
 0x15e   : > { %v2351_v3 = vunpack.i.h.bf16 %v2349_v50  ;;  %v2350_v30 = vunpack.i.l.bf16 %v2349_v50  ;;  %v1400_v54 = vsel %vm1389_vm6, %v1367_v36, %v2335_v19  ;;  %v1401_v20 = vsel %vm1389_vm6, %v1368_v44, %v2336_v13 }
 0x15f   : > { %v2344_v14 = vpop.permute.xlu0 %2343 }
 0x160   : > { %v2346_v24 = vunpack.i.h.bf16 %v2344_v14  ;;  %v2345_v0 = vunpack.i.l.bf16 %v2344_v14  ;;  %v1449_v57 = vsel %vm1422_vm7, %v1416_v8, %v2350_v30  ;;  %v1450_v33 = vsel %vm1422_vm7, %v1417_v51, %v2351_v3 }
 0x161   : > { %v2359_v59 = vpop.permute.xlu1 %2358 }
 0x162   : > { %v2361_v60 = vunpack.i.h.bf16 %v2359_v59  ;;  %v2360_v10 = vunpack.i.l.bf16 %v2359_v59  ;;  %v1433_v35 = vsel %vm1422_vm7, %v1400_v54, %v2345_v0  ;;  %v1434_v31 = vsel %vm1422_vm7, %v1401_v20, %v2346_v24  ;;  %v4063_v59 = vld [vmem:[#allocation17_spill] sm:$0xff] }
 0x163   : > { %v2354_v48 = vpop.permute.xlu0 %2353 }
 0x164   : > { %v2356_v56 = vunpack.i.h.bf16 %v2354_v48  ;;  %v2355_v22 = vunpack.i.l.bf16 %v2354_v48  ;;  %v1482_v27 = vsel %vm1455_vm8, %v1449_v57, %v2360_v10  ;;  %v1483_v32 = vsel %vm1455_vm8, %v1450_v33, %v2361_v60 }
 0x165   : > { %v2369_v18 = vpop.permute.xlu1 %2368 }
 0x166   : > { %v2371_v28 = vunpack.i.h.bf16 %v2369_v18  ;;  %v2370_v34 = vunpack.i.l.bf16 %v2369_v18  ;;  %v1466_v9 = vsel %vm1455_vm8, %v1433_v35, %v2355_v22  ;;  %v1467_v21 = vsel %vm1455_vm8, %v1434_v31, %v2356_v56  ;;  %v4064_v18 = vld [vmem:[#allocation18_spill] sm:$0xff] }
 0x167   : > { %v2364_v62 = vpop.permute.xlu0 %2363 }
 0x168   : > { %v1515_v40 = vsel %vm1488_vm9, %v1482_v27, %v2370_v34  ;;  %v1516_v39 = vsel %vm1488_vm9, %v1483_v32, %v2371_v28  ;;  %v2366_v5 = vunpack.i.h.bf16 %v2364_v62  ;;  %v2365_v41 = vunpack.i.l.bf16 %v2364_v62 }
 0x169   : > { %v1534_v47 = vpack.c.bf16 %v1516_v39, %v1515_v40  ;;  %v2379_v58 = vpop.permute.xlu1 %2378 }
 0x16a   : > { %v1499_v25 = vsel %vm1488_vm9, %v1466_v9, %v2365_v41  ;;  %v1500_v16 = vsel %vm1488_vm9, %v1467_v21, %v2366_v5  ;;  %v2381_v49 = vunpack.i.h.bf16 %v2379_v58  ;;  %v2380_v23 = vunpack.i.l.bf16 %v2379_v58 }
 0x16b   : > { %v2374_v2 = vpop.permute.xlu0 %2373  ;;  %1774 = vmatprep.subr.msk.bf16.mxu0 %vm1544_vm10, %v1534_v47  ;;  %v1526_v29 = vpack.c.bf16 %v1500_v16, %v1499_v25 }
 0x16c   : > { %v2375_v63 = vunpack.i.l.bf16 %v2374_v2  ;;  %v1369_v42 = vsel %vm1356_vm5, %v4061_v43, %v2380_v23  ;;  %v1370_v13 = vsel %vm1356_vm5, %v4062_v45, %v2381_v49  ;;  %v2376_v19 = vunpack.i.h.bf16 %v2374_v2 }
 0x16d   : > { %v1564_v53 = vsel %vm1544_vm10, %v1526_v29, 0  ;;  %v2389_v11 = vpop.permute.xlu1 %2388 }
 0x16e   : > { %1762 = vmatpush3.bf16.xpose.msra.mxu0 %v1564_v53  ;;  %v2391_v50 = vunpack.i.h.bf16 %v2389_v11  ;;  %v2390_v17 = vunpack.i.l.bf16 %v2389_v11  ;;  %v1352_v4 = vsel %vm1323_vm4, %v4063_v59, %v2375_v63  ;;  %v1353_v57 = vsel %vm1323_vm4, %v4064_v18, %v2376_v19 }
 0x16f   : > { %v2384_v55 = vpop.permute.xlu0 %2383 }
 0x170   : > { %v1402_v46 = vsel %vm1389_vm6, %v1369_v42, %v2390_v17  ;;  %v1403_v3 = vsel %vm1389_vm6, %v1370_v13, %v2391_v50  ;;  %v2386_v30 = vunpack.i.h.bf16 %v2384_v55  ;;  %v2385_v24 = vunpack.i.l.bf16 %v2384_v55 }
 0x171   : > { %v2399_v12 = vpop.permute.xlu1 %2398 }
 0x172   : > { %v2401_v14 = vunpack.i.h.bf16 %v2399_v12  ;;  %v2400_v52 = vunpack.i.l.bf16 %v2399_v12  ;;  %v1385_v31 = vsel %vm1356_vm5, %v1352_v4, %v2385_v24  ;;  %v1386_v27 = vsel %vm1356_vm5, %v1353_v57, %v2386_v30 }
 0x173   : > { %v2394_v15 = vpop.permute.xlu0 %2393 }
 0x174   : > { %v1435_v60 = vsel %vm1422_vm7, %v1402_v46, %v2400_v52  ;;  %v1436_v10 = vsel %vm1422_vm7, %v1403_v3, %v2401_v14  ;;  %v2396_v44 = vunpack.i.h.bf16 %v2394_v15  ;;  %v2395_v37 = vunpack.i.l.bf16 %v2394_v15 }
 0x175   : > { %v2409_v6 = vpop.permute.xlu1 %2408 }
 0x176   : > { %v2411_v1 = vunpack.i.h.bf16 %v2409_v6  ;;  %v2410_v26 = vunpack.i.l.bf16 %v2409_v6  ;;  %v1418_v32 = vsel %vm1389_vm6, %v1385_v31, %v2395_v37  ;;  %v1419_v62 = vsel %vm1389_vm6, %v1386_v27, %v2396_v44 }
 0x177   : > { %v2404_v61 = vpop.permute.xlu0 %2403 }
 0x178   : > { %v1468_v36 = vsel %vm1455_vm8, %v1435_v60, %v2410_v26  ;;  %v1469_v8 = vsel %vm1455_vm8, %v1436_v10, %v2411_v1  ;;  %v2406_v54 = vunpack.i.h.bf16 %v2404_v61  ;;  %v2405_v20 = vunpack.i.l.bf16 %v2404_v61  ;;  %v4065_v1 = vld [vmem:[#allocation14_spill] sm:$0xff]  ;;  %v4066_v61 = vld [vmem:[#allocation15_spill] sm:$0xff] }
 0x179   : > { %v2419_v0 = vpop.permute.xlu1 %2418  ;;  %v4067_v10 = vld [vmem:[#allocation6_spill] sm:$0xff] }
 0x17a   : > { %v2421_v48 = vunpack.i.h.bf16 %v2419_v0  ;;  %v2420_v38 = vunpack.i.l.bf16 %v2419_v0  ;;  %v1451_v39 = vsel %vm1422_vm7, %v1418_v32, %v2405_v20  ;;  %v1452_v5 = vsel %vm1422_vm7, %v1419_v62, %v2406_v54 }
 0x17b   : > { %v2414_v51 = vpop.permute.xlu0 %2413 }
 0x17c   : > { %v1501_v56 = vsel %vm1488_vm9, %v1468_v36, %v2420_v38  ;;  %v1502_v22 = vsel %vm1488_vm9, %v1469_v8, %v2421_v48  ;;  %v2416_v33 = vunpack.i.h.bf16 %v2414_v51  ;;  %v2415_v28 = vunpack.i.l.bf16 %v2414_v51  ;;  %v4068_v38 = vld [vmem:[#allocation5_spill] sm:$0xff] }
 0x17d   : > { %v2429_v34 = vpop.permute.xlu1 %2428  ;;  %v1527_v35 = vpack.c.bf16 %v1502_v22, %v1501_v56 }
 0x17e   : > { %v1484_v21 = vsel %vm1455_vm8, %v1451_v39, %v2415_v28  ;;  %v1485_v47 = vsel %vm1455_vm8, %v1452_v5, %v2416_v33  ;;  %v2431_v12 = vunpack.i.h.bf16 %v2429_v34  ;;  %v2430_v15 = vunpack.i.l.bf16 %v2429_v34 }
 0x17f   : > { %v2424_v40 = vpop.permute.xlu0 %2423  ;;  %v1567_v53 = vsel %vm1544_vm10, %v1527_v35, 0 }
 0x180   : > { %v2426_v41 = vunpack.i.h.bf16 %v2424_v40  ;;  %v2425_v9 = vunpack.i.l.bf16 %v2424_v40  ;;  %v1355_v26 = vsel %vm1323_vm4, %v4065_v1, %v2431_v12  ;;  %v1354_v43 = vsel %vm1323_vm4, %v4066_v61, %v2430_v15 }
 0x181   : > { %v2439_v58 = vpop.permute.xlu1 %2438 }
 0x182   : > { %v1517_v25 = vsel %vm1488_vm9, %v1484_v21, %v2425_v9  ;;  %v1518_v16 = vsel %vm1488_vm9, %v1485_v47, %v2426_v41  ;;  %v2441_v23 = vunpack.i.h.bf16 %v2439_v58  ;;  %v2440_v63 = vunpack.i.l.bf16 %v2439_v58 }
 0x183   : > { %v1535_v2 = vpack.c.bf16 %v1518_v16, %v1517_v25  ;;  %v2434_v29 = vpop.permute.xlu0 %2433 }
 0x184   : > { %v2436_v17 = vunpack.i.h.bf16 %v2434_v29  ;;  %v2435_v6 = vunpack.i.l.bf16 %v2434_v29  ;;  %v1387_v19 = vsel %vm1356_vm5, %v1354_v43, %v2440_v63  ;;  %v1388_v59 = vsel %vm1356_vm5, %v1355_v26, %v2441_v23 }
 0x185   : > { %1775 = vmatprep.subr.msk.bf16.mxu0 %vm1544_vm10, %v1535_v2  ;;  %v2449_v11 = vpop.permute.xlu1 %2448 }
 0x186   : > { %1764 = vmatpush3.bf16.xpose.msra.mxu0 %v1567_v53  ;;  %v2451_v14 = vunpack.i.h.bf16 %v2449_v11  ;;  %v2450_v52 = vunpack.i.l.bf16 %v2449_v11  ;;  %v1372_v48 = vsel %vm1356_vm5, %v4067_v10, %v2436_v17  ;;  %v1371_v44 = vsel %vm1356_vm5, %v4068_v38, %v2435_v6 }
 0x187   : > { %v2444_v55 = vpop.permute.xlu0 %2443 }
 0x188   : > { %v2446_v42 = vunpack.i.h.bf16 %v2444_v55  ;;  %v2445_v45 = vunpack.i.l.bf16 %v2444_v55  ;;  %v1420_v37 = vsel %vm1389_vm6, %v1387_v19, %v2450_v52  ;;  %v1421_v36 = vsel %vm1389_vm6, %v1388_v59, %v2451_v14 }
 0x189   : > { %v2459_v49 = vpop.permute.xlu1 %2458 }
 0x18a   : > { %v2461_v4 = vunpack.i.h.bf16 %v2459_v49  ;;  %v2460_v46 = vunpack.i.l.bf16 %v2459_v49  ;;  %v1404_v8 = vsel %vm1389_vm6, %v1371_v44, %v2445_v45  ;;  %v1405_v51 = vsel %vm1389_vm6, %v1372_v48, %v2446_v42 }
 0x18b   : > { %v2454_v50 = vpop.permute.xlu0 %2453 }
 0x18c   : > { %v2456_v3 = vunpack.i.h.bf16 %v2454_v50  ;;  %v2455_v30 = vunpack.i.l.bf16 %v2454_v50  ;;  %v1453_v22 = vsel %vm1422_vm7, %v1420_v37, %v2460_v46  ;;  %v1454_v18 = vsel %vm1422_vm7, %v1421_v36, %v2461_v4 }
 0x18d   : > { %v2469_v13 = vpop.permute.xlu1 %2468 }
 0x18e   : > { %v2471_v24 = vunpack.i.h.bf16 %v2469_v13  ;;  %v2470_v0 = vunpack.i.l.bf16 %v2469_v13  ;;  %v1437_v28 = vsel %vm1422_vm7, %v1404_v8, %v2455_v30  ;;  %v1438_v34 = vsel %vm1422_vm7, %v1405_v51, %v2456_v3 }
 0x18f   : > { %v2464_v60 = vpop.permute.xlu0 %2463 }
 0x190   : > { %v2466_v54 = vunpack.i.h.bf16 %v2464_v60  ;;  %v2465_v20 = vunpack.i.l.bf16 %v2464_v60  ;;  %v1486_v35 = vsel %vm1455_vm8, %v1453_v22, %v2470_v0  ;;  %v1487_v31 = vsel %vm1455_vm8, %v1454_v18, %v2471_v24 }
 0x191   : > { %v2479_v56 = vpop.permute.xlu1 %2478 }
 0x192   : > { %v2481_v57 = vunpack.i.h.bf16 %v2479_v56  ;;  %v2480_v33 = vunpack.i.l.bf16 %v2479_v56  ;;  %v1470_v5 = vsel %vm1455_vm8, %v1437_v28, %v2465_v20  ;;  %v1471_v41 = vsel %vm1455_vm8, %v1438_v34, %v2466_v54 }
 0x193   : > { %v2474_v27 = vpop.permute.xlu0 %2473 }
 0x194   : > { %v1519_v32 = vsel %vm1488_vm9, %v1486_v35, %v2480_v33  ;;  %v1520_v62 = vsel %vm1488_vm9, %v1487_v31, %v2481_v57  ;;  %v2476_v40 = vunpack.i.h.bf16 %v2474_v27  ;;  %v2475_v39 = vunpack.i.l.bf16 %v2474_v27 }
 0x195   : > { %v1536_v9 = vpack.c.bf16 %v1520_v62, %v1519_v32 }
 0x196   : > { %v1503_v21 = vsel %vm1488_vm9, %v1470_v5, %v2475_v39  ;;  %v1504_v47 = vsel %vm1488_vm9, %v1471_v41, %v2476_v40 }
 0x197   : > { %1776 = vmatprep.subr.msk.bf16.mxu0 %vm1544_vm10, %v1536_v9  ;;  %v1528_v58 = vpack.c.bf16 %v1504_v47, %v1503_v21 }
 0x199   : > { %v1570_v25 = vsel %vm1544_vm10, %v1528_v58, 0 }
 0x19a   : > { %1766 = vmatpush3.bf16.xpose.msra.mxu0 %v1570_v25 }
 0x1a1   : > { %1768 = vmatmul.mubr.msk.bf16.vlgmr.msra.gmra.mrb[0].mxu0 %vm1544_vm10, %v3695_v7 }
 0x1a4   : > { %v1542_v16 = vpop.permute.xlu0 %1541 }
 0x274   : > { %v1630_v2 = vpop.f32.mrb[0].mxu0 }
 0x275   : > { %v1631_v29 = vadd.f32 %v1630_v2, %v1542_v16  ;;  %v1632_v53 = vpop.f32.mrb[1].mxu0 }
 0x276   : > { %v1633_v11 = vadd.f32 %v1632_v53, %v1542_v16  ;;  %v1634_v55 = vpop.f32.mrb[2].mxu0 }
 0x277   : > { %v1637_v12 = vmax.f32 %v1631_v29, 0.0  ;;  %v1635_v15 = vpop.f32.mrb[3].mxu0 }
 0x278   : > { %v1638_v49 = vmax.f32 %v1633_v11, 0.0 }
 0x279   : > { %1639 = vst [vmem:[%s187_s29] sm:$0xff] %v1637_v12 }
 0x27a   : > { %1640 = vst [vmem:[%s187_s29 + $0x8] sm:$0xff] %v1638_v49 }
 0x27b   : > { %2512 = shalt.err (!%p2509_p5)
}
 0x27c   : > { %s2513_s11 = scalar_lea.hbm %s3930_s6, 256  ;;  %s2517_s21 = scalar_lea.hbm %s3980_s3, 512 }
 0x27d   : > { %p2514_p6 = scmp.ne.s32.totalorder %s3930_s6, %s2513_s11  ;;  %p2518_p10 = scmp.lt.u32.totalorder %s3930_s6, %s3980_s3 }
 0x27e   : > { %p2519_p11 = scmp.lt.u32.totalorder %s2517_s21, %s2513_s11  ;;  %p2521_p13 = scmp.lt.u32.totalorder %s2513_s11, %s3930_s6 }
 0x27f   : > { %p2515_p7 = pnand %p2514_p6, %p2649_p4 }
 0x280   : > { %p2520_p12 = por %p2519_p11, %p2518_p10 }
 0x281   : > { %p2516_p9 = pneg %p2515_p7 }
 0x282   : > { %p2522_p0 = por %p2521_p13, %p2520_p12 }
 0x284   : > { %p2523_p1 = pnand %p2522_p0, %p2516_p9 }
 0x286   : > { %2526 = shalt.err (!%p2523_p1)
}
 0x287   : > { %1778 = dma.vmem_to_hbm [thread:$0]  (%p2649_p4), %s3932_s30, 256, %s3930_s6, %s1642_s15  }
 0x288 PF: > { %p1784_p2 = scmp.ge.s32.totalorder %s2577_s17, 2  ;;  %s1670_s27 = sand.u32 1, %s2557_s12  }
 0x289   : > { %s1671_s28 = scalar_lea.sflag [#allocation3], %s1670_s27 }
 0x28a   : > { %p1781_p3 = pnand %p1784_p2, %p2656_p8 }
 0x28c   : > { %2552 = dma.done.wait (!%p1781_p3), %s1671_s28, 256  }
 0x28d   : > { %2554 = vsyncadd (!%p1781_p3), %s1671_s28, 4294967040  ;;  %s16_s17 = sadd.s32 1, %s2577_s17   ;;  %s4069_s12 = smov %s2561_s13 }
 0x28e   : > { %p13_p5 = scmp.ge.s32.totalorder %s16_s17, 4   ;;  %s4070_s13 = smov %s2565_s14 }
 0x28f   : > { %s4071_s14 = smov %s2662_s25  ;;  %s4072_s15 = smov %s2573_s16 }
 0x290   : > { %s4073_s16 = smov %s4075_s20  ;;  %15 = sbr.rel (!%p13_p5) target bundleno = 4 (0x4), region = 67 }
 0x297   :  { %1676 = vsyncpa [#allocation3], 1 }
 0x298   :  { %1678 = vsyncpa [#allocation3 + $0x1], 1 }

</bundles_post_ra>
